<compile_context>
chip_gen: v7x
topology: tpu7x:2x2x1
jax: 0.10.0
libtpu: 0.0.40
codegen_flags: <defaults>
</compile_context>

<pallas_src>
import math

import numpy as np
import jax
import jax.numpy as jnp
from jax.experimental import pallas as pl
from jax.experimental.pallas import tpu as pltpu

LN_EPS = 1e-6  # makani uses nn.LayerNorm(normalized_shape=(H, W), eps=1e-6)


def _gelu_tanh(x):
    # tanh-approx GELU (EUP tanh). |diff| from exact erf-GELU <~ 1e-3.
    return 0.5 * x * (1.0 + jnp.tanh(0.7978845608028654 * (x + 0.044715 * x * x * x)))


# ----------------------------------------------------------------------------- fused block kernel
def _fno_block_kernel(x_ref, ln_ref, afwd_ref, wr_ref, wi_ref, binv_ref,
                      cbias_ref, skw_ref, o_ref):
    Bt, C, HW = x_ref.shape           # batch tile, channels, H*W (lane axis)
    ML = wr_ref.shape[-1]             # flattened spectral modes M*L
    R = Bt * C                        # rows fed to the MXU
    inv_hw = 1.0 / HW

    ln = ln_ref[...]
    ln0w, ln0b, ln1w, ln1b = ln[0:1], ln[1:2], ln[2:3], ln[3:4]   # (1, HW) each

    x = x_ref[...].reshape(R, HW)     # lane-dense slab, all rows of the batch tile

    # --- LayerNorm0 over flattened spatial axis (single lane reduction) ----------
    mean0 = jnp.sum(x, axis=-1, keepdims=True) * inv_hw
    xc = x - mean0
    var0 = jnp.sum(xc * xc, axis=-1, keepdims=True) * inv_hw
    xn = xc * jax.lax.rsqrt(var0 + LN_EPS) * ln0w + ln0b          # (R, HW) f32
    xnb = xn.astype(jnp.bfloat16)                                  # MXU operand

    # --- forward S2 transform: packed [re|im] operator, ONE MXU matmul -----------
    c_pack = jnp.dot(xnb, afwd_ref[...], preferred_element_type=jnp.float32)  # (R, 2ML)
    c3 = c_pack.reshape(Bt, C, 2 * ML)
    cr = c3[..., :ML]                  # (Bt, C, ML)
    ci = c3[..., ML:]

    # --- diagonal complex channel mixing (VALU, f32): accumulate over Cin --------
    # y[b,o,ml] = sum_i c[b,i,ml] * w[i,o,ml]   (complex)
    yr = jnp.zeros((Bt, C, ML), jnp.float32)
    yi = jnp.zeros((Bt, C, ML), jnp.float32)
    for i in range(C):                 # C is small; use lax.fori_loop(unroll=N) for large C
        wr_i = wr_ref[i]               # (C, ML)
        wi_i = wi_ref[i]
        cr_i = cr[:, i:i + 1, :]       # (Bt, 1, ML)
        ci_i = ci[:, i:i + 1, :]
        yr = yr + cr_i * wr_i - ci_i * wi_i
        yi = yi + cr_i * wi_i + ci_i * wr_i

    # pack [yr | yi] along the mode axis to match the stacked inverse operator
    y_pack = jnp.concatenate([yr, yi], axis=-1).reshape(R, 2 * ML).astype(jnp.bfloat16)

    # --- inverse transform: stacked [re ; im] operator, ONE MXU matmul -----------
    x_filt = jnp.dot(y_pack, binv_ref[...], preferred_element_type=jnp.float32)  # (R, HW)

    cb = cbias_ref[...]                # (C, 2): [:,0]=filter bias, [:,1]=skip bias
    fbias = cb[:, 0:1]
    skb = cb[:, 1:2]
    x_filt3 = x_filt.reshape(Bt, C, HW) + fbias                    # (Bt, C, HW)

    # --- inner skip: 1x1 conv on residual (= xn), per-batch MXU matmul -----------
    skw = skw_ref[...]                 # (C, C) bf16
    skips = [jnp.dot(skw, xnb[b * C:(b + 1) * C, :],
                     preferred_element_type=jnp.float32) for b in range(Bt)]
    skip = jnp.stack(skips, axis=0) + skb                          # (Bt, C, HW)

    # --- GELU + LayerNorm1 --------------------------------------------------------
    act = _gelu_tanh(x_filt3 + skip).reshape(R, HW)
    mean1 = jnp.sum(act, axis=-1, keepdims=True) * inv_hw
    ac = act - mean1
    var1 = jnp.sum(ac * ac, axis=-1, keepdims=True) * inv_hw
    out = ac * jax.lax.rsqrt(var1 + LN_EPS) * ln1w + ln1b
    o_ref[...] = out.reshape(Bt, C, HW).astype(o_ref.dtype)


def _pick_batch_tile(B, C, target_rows=256, min_grid_steps=1):
    """Largest divisor of B with Bt*C <= target MXU rows (and >= min grid steps).

    On v7x (2 TensorCores) pass min_grid_steps=2 so both cores get work; on
    v5e/v6e (1 TC) prefer the largest tile. target_rows=128 saturates v5e's MXU.
    """
    best = 1
    for cand in range(1, B + 1):
        if B % cand:
            continue
        if cand * C <= target_rows and (B // cand) >= min_grid_steps:
            best = cand
    return best


def fno_block_forward(x, kp, batch_tile=None):
    """x: (B, C, H, W); kp: kernel-ready params from prepare_kernel_params()."""
    B, C, H, W = x.shape
    HW = H * W
    ML = kp["w_re"].shape[-1]
    Bt = batch_tile if batch_tile is not None else _pick_batch_tile(B, C)
    nb = B // Bt
    x2 = x.reshape(B, C, HW)           # lane-dense layout for the kernel

    inv2 = lambda b: (0, 0)            # grid-invariant operands
    inv3 = lambda b: (0, 0, 0)

    # VMEM here is tiny (< 1 MiB of operators/weights); at scale: size Bt against
    # the scoped VMEM limit (32 MiB default; v7x has only 64 MiB physical), set
    # vmem_limit_bytes in CompilerParams, and put pipeline_mode=pl.Buffered(1)
    # on the grid-invariant specs below to drop their second pipeline buffer.
    out = pl.pallas_call(
        _fno_block_kernel,
        out_shape=jax.ShapeDtypeStruct((B, C, HW), x.dtype),
        grid=(nb,),
        in_specs=[
            pl.BlockSpec((Bt, C, HW), lambda b: (b, 0, 0)),  # x (batch tile)
            pl.BlockSpec((4, HW), inv2),                     # ln0_w/ln0_b/ln1_w/ln1_b
            pl.BlockSpec((HW, 2 * ML), inv2),                # fwd operator [re|im], bf16
            pl.BlockSpec((C, C, ML), inv3),                  # spectral weight (real), f32
            pl.BlockSpec((C, C, ML), inv3),                  # spectral weight (imag), f32
            pl.BlockSpec((2 * ML, HW), inv2),                # inv operator [re;im], bf16
            pl.BlockSpec((C, 2), inv2),                      # [filter bias | skip bias]
            pl.BlockSpec((C, C), inv2),                      # inner-skip 1x1 weight, bf16
        ],
        out_specs=pl.BlockSpec((Bt, C, HW), lambda b: (b, 0, 0)),
        compiler_params=pltpu.CompilerParams(
            dimension_semantics=("parallel",)),              # independent batch tiles
    )(x2, kp["ln"], kp["afwd"], kp["w_re"], kp["w_im"], kp["binv"],
      kp["cbias"], kp["skip_w"])
    return out.reshape(B, C, H, W)


# ----------------------------------------------------------------------------- params
def make_params(key, C, H, W):
    M = W // 2 + 1
    L = H
    ks = jax.random.split(key, 7)

    wg = np.arange(W)[:, None].astype(np.float64)
    mg = np.arange(M)[None, :].astype(np.float64)
    ang = 2.0 * np.pi * wg * mg / W
    dft_re = np.cos(ang).astype(np.float32)                          # (W, M)
    dft_im = (-np.sin(ang)).astype(np.float32)
    cm = np.full((M,), 2.0, np.float64)
    cm[0] = 1.0
    if W % 2 == 0:
        cm[-1] = 1.0
    ang2 = 2.0 * np.pi * np.arange(M)[:, None].astype(np.float64) * np.arange(W)[None, :] / W
    idft_re = (cm[:, None] * np.cos(ang2) / W).astype(np.float32)    # (M, W)
    idft_im = (-cm[:, None] * np.sin(ang2) / W).astype(np.float32)

    # TODO(synk): leg_fwd / leg_inv are deterministic random stand-ins for the precomputed
    # associated-Legendre + quadrature tables of torch_harmonics.RealSHT / InverseRealSHT.
    return {
        "ln0_w": jnp.ones((H, W), jnp.float32),
        "ln0_b": jnp.zeros((H, W), jnp.float32),
        "ln1_w": jnp.ones((H, W), jnp.float32),
        "ln1_b": jnp.zeros((H, W), jnp.float32),
        "dft_re": jnp.asarray(dft_re),
        "dft_im": jnp.asarray(dft_im),
        "idft_re": jnp.asarray(idft_re),
        "idft_im": jnp.asarray(idft_im),
        "leg_fwd": jax.random.normal(ks[0], (M, L, H), jnp.float32) * float(1.0 / math.sqrt(H)),
        "leg_inv": jax.random.normal(ks[1], (M, H, L), jnp.float32) * float(1.0 / math.sqrt(L)),
        "w_re": jax.random.normal(ks[2], (C, C, M, L), jnp.float32) * float(1.0 / C),
        "w_im": jax.random.normal(ks[3], (C, C, M, L), jnp.float32) * float(1.0 / C),
        "filt_bias": jax.random.normal(ks[4], (C,), jnp.float32) * 0.1,
        "skip_w": jax.random.normal(ks[5], (C, C), jnp.float32) * float(1.0 / math.sqrt(C)),
        "skip_b": jax.random.normal(ks[6], (C,), jnp.float32) * 0.1,
    }


def prepare_kernel_params(p, H, W):
    """Host precompute: fused (DFT (x) Legendre) operators, packed layouts, MXU dtypes."""
    legf = np.asarray(p["leg_fwd"], np.float64)     # (M, L, H)
    legi = np.asarray(p["leg_inv"], np.float64)     # (M, H, L)
    dft_re = np.asarray(p["dft_re"], np.float64)    # (W, M)
    dft_im = np.asarray(p["dft_im"], np.float64)
    idft_re = np.asarray(p["idft_re"], np.float64)  # (M, W)
    idft_im = np.asarray(p["idft_im"], np.float64)
    M, L = legf.shape[0], legf.shape[1]
    HW, ML = H * W, M * L

    # Forward: coeff[c,(m,l)] = sum_{h,w} x[c,(h,w)] * legf[m,l,h] * dft[w,m]
    afwd_re = np.einsum("mlh,wm->hwml", legf, dft_re).reshape(HW, ML)
    afwd_im = np.einsum("mlh,wm->hwml", legf, dft_im).reshape(HW, ML)
    # Inverse: out[o,(h,w)] = sum_{m,l} yr*legi[m,h,l]*idft_re[m,w] + yi*legi*idft_im
    binv_re = np.einsum("mhl,mw->mlhw", legi, idft_re).reshape(ML, HW)
    binv_im = np.einsum("mhl,mw->mlhw", legi, idft_im).reshape(ML, HW)

    # Packed operators: one forward matmul -> [cr|ci]; one inverse matmul <- [yr|yi]
    afwd = np.concatenate([afwd_re, afwd_im], axis=1)   # (HW, 2*ML)
    binv = np.concatenate([binv_re, binv_im], axis=0)   # (2*ML, HW)

    C = int(p["skip_w"].shape[0])
    f32 = np.float32
    ln = np.stack([np.asarray(p["ln0_w"], f32).reshape(HW),
                   np.asarray(p["ln0_b"], f32).reshape(HW),
                   np.asarray(p["ln1_w"], f32).reshape(HW),
                   np.asarray(p["ln1_b"], f32).reshape(HW)], axis=0)   # (4, HW)
    cbias = np.stack([np.asarray(p["filt_bias"], f32),
                      np.asarray(p["skip_b"], f32)], axis=1)           # (C, 2)
    return {
        "ln": jnp.asarray(ln),
        "afwd": jnp.asarray(afwd.astype(f32)).astype(jnp.bfloat16),    # MXU operand
        "binv": jnp.asarray(binv.astype(f32)).astype(jnp.bfloat16),    # MXU operand
        "w_re": jnp.asarray(np.asarray(p["w_re"], f32).reshape(C, C, ML)),  # VALU, keep f32
        "w_im": jnp.asarray(np.asarray(p["w_im"], f32).reshape(C, C, ML)),
        "cbias": jnp.asarray(cbias),
        "skip_w": jnp.asarray(np.asarray(p["skip_w"], f32)).astype(jnp.bfloat16),
    }


# ----------------------------------------------------------------------------- numpy reference
def reference_forward_np(x, p):
    xp = np.asarray(x, np.float64)
    pp = {k: np.asarray(v, np.float64) for k, v in p.items()}

    def ln(v, w, b):
        mu = v.mean(axis=(-2, -1), keepdims=True)
        var = ((v - mu) ** 2).mean(axis=(-2, -1), keepdims=True)
        return (v - mu) / np.sqrt(var + LN_EPS) * w + b

    xn = ln(xp, pp["ln0_w"], pp["ln0_b"])
    f = (np.einsum("bchw,wm->bchm", xn, pp["dft_re"])
         + 1j * np.einsum("bchw,wm->bchm", xn, pp["dft_im"]))
    coeff = np.einsum("mlh,bchm->bcml", pp["leg_fwd"], f)
    wgt = pp["w_re"] + 1j * pp["w_im"]                       # (Cin, Cout, M, L)
    y = np.einsum("biml,ioml->boml", coeff, wgt)
    g = np.einsum("mhl,boml->bomh", pp["leg_inv"], y)
    x_filt = (np.einsum("bomh,mw->bohw", g.real, pp["idft_re"])
              + np.einsum("bomh,mw->bohw", g.imag, pp["idft_im"]))
    x_filt = x_filt + pp["filt_bias"][None, :, None, None]
    skip = (np.einsum("oi,bihw->bohw", pp["skip_w"], xn)
            + pp["skip_b"][None, :, None, None])
    pre = x_filt + skip
    erf_v = np.vectorize(math.erf)
    act = 0.5 * pre * (1.0 + erf_v(pre / math.sqrt(2.0)))    # exact erf GELU
    return ln(act, pp["ln1_w"], pp["ln1_b"])


# ----------------------------------------------------------------------------- main
if __name__ == "__main__":
    B, C, H, W = 2, 8, 16, 16     # batch, embed_dim, nlat, nlon
    key = jax.random.PRNGKey(0)
    kx, kp = jax.random.split(key)
    x = jax.random.normal(kx, (B, C, H, W), jnp.float32)
    params = make_params(kp, C, H, W)
    kparams = prepare_kernel_params(params, H, W)

    out = jax.jit(fno_block_forward)(x, kparams)
    out = jax.block_until_ready(out)

    # Tolerance accounts for bf16 MXU operands (f32 accumulation) and tanh-GELU
    # vs. the float64 / exact-erf reference.
    ref = reference_forward_np(x, params)
    np.testing.assert_allclose(np.asarray(out), ref, rtol=4e-2, atol=4e-2)
    print("KERNEL_OK")
</pallas_src>

<mosaic_0001>
module attributes {stable_mosaic.version = 11 : i64} {
  func.func @_fno_block_kernel(%arg0: i32, %arg1: memref<2x8x256xf32, #tpu.memory_space<vmem>>, %arg2: memref<4x256xf32, #tpu.memory_space<vmem>>, %arg3: memref<256x288xbf16, #tpu.memory_space<vmem>>, %arg4: memref<8x8x144xf32, #tpu.memory_space<vmem>>, %arg5: memref<8x8x144xf32, #tpu.memory_space<vmem>>, %arg6: memref<288x256xbf16, #tpu.memory_space<vmem>>, %arg7: memref<8x2xf32, #tpu.memory_space<vmem>>, %arg8: memref<8x8xbf16, #tpu.memory_space<vmem>>, %arg9: memref<2x8x256xf32, #tpu.memory_space<vmem>>) attributes {dimension_semantics = [#tpu.dimension_semantics<parallel>], iteration_bounds = array<i64: 1>, scalar_prefetch = 0 : i64, scratch_operands = 0 : i64, tpu.core_type = #tpu.core_type<tc>, window_params = [{transform_indices = @transform_0, window_bounds = array<i64: 2, 8, 256>}, {pipeline_mode = #tpu.pipeline_mode<synchronous>, transform_indices = @transform_1, window_bounds = array<i64: 4, 256>}, {pipeline_mode = #tpu.pipeline_mode<synchronous>, transform_indices = @transform_2, window_bounds = array<i64: 256, 288>}, {pipeline_mode = #tpu.pipeline_mode<synchronous>, transform_indices = @transform_3, window_bounds = array<i64: 8, 8, 144>}, {pipeline_mode = #tpu.pipeline_mode<synchronous>, transform_indices = @transform_4, window_bounds = array<i64: 8, 8, 144>}, {pipeline_mode = #tpu.pipeline_mode<synchronous>, transform_indices = @transform_5, window_bounds = array<i64: 288, 256>}, {pipeline_mode = #tpu.pipeline_mode<synchronous>, transform_indices = @transform_6, window_bounds = array<i64: 8, 2>}, {pipeline_mode = #tpu.pipeline_mode<synchronous>, transform_indices = @transform_7, window_bounds = array<i64: 8, 8>}, {transform_indices = @transform_8, window_bounds = array<i64: 2, 8, 256>}]} {
    %c0 = arith.constant 0 : index
    %c0_0 = arith.constant 0 : index
    %0 = vector.load %arg2[%c0, %c0_0] : memref<4x256xf32, #tpu.memory_space<vmem>>, vector<4x256xf32>
    %1 = vector.extract_strided_slice %0 {offsets = [0, 0], sizes = [1, 256], strides = [1, 1]} : vector<4x256xf32> to vector<1x256xf32>
    %2 = vector.extract_strided_slice %0 {offsets = [1, 0], sizes = [1, 256], strides = [1, 1]} : vector<4x256xf32> to vector<1x256xf32>
    %3 = vector.extract_strided_slice %0 {offsets = [2, 0], sizes = [1, 256], strides = [1, 1]} : vector<4x256xf32> to vector<1x256xf32>
    %4 = vector.extract_strided_slice %0 {offsets = [3, 0], sizes = [1, 256], strides = [1, 1]} : vector<4x256xf32> to vector<1x256xf32>
    %c0_1 = arith.constant 0 : index
    %c0_2 = arith.constant 0 : index
    %c0_3 = arith.constant 0 : index
    %5 = vector.load %arg1[%c0_1, %c0_2, %c0_3] : memref<2x8x256xf32, #tpu.memory_space<vmem>>, vector<2x8x256xf32>
    %6 = vector.shape_cast %5 : vector<2x8x256xf32> to vector<16x256xf32>
    %cst = arith.constant dense<0.000000e+00> : vector<16xf32>
    %7 = vector.multi_reduction <add>, %6, %cst [1] : vector<16x256xf32> to vector<16xf32>
    %8 = vector.shape_cast %7 : vector<16xf32> to vector<16x1xf32>
    %cst_4 = arith.constant 3.906250e-03 : f32
    %9 = vector.broadcast %cst_4 : f32 to vector<16x1xf32>
    %10 = arith.mulf %8, %9 : vector<16x1xf32>
    %11 = vector.broadcast %10 : vector<16x1xf32> to vector<16x256xf32>
    %12 = arith.subf %6, %11 : vector<16x256xf32>
    %13 = arith.mulf %12, %12 : vector<16x256xf32>
    %cst_5 = arith.constant dense<0.000000e+00> : vector<16xf32>
    %14 = vector.multi_reduction <add>, %13, %cst_5 [1] : vector<16x256xf32> to vector<16xf32>
    %15 = vector.shape_cast %14 : vector<16xf32> to vector<16x1xf32>
    %cst_6 = arith.constant 3.906250e-03 : f32
    %16 = vector.broadcast %cst_6 : f32 to vector<16x1xf32>
    %17 = arith.mulf %15, %16 : vector<16x1xf32>
    %cst_7 = arith.constant 9.99999997E-7 : f32
    %18 = vector.broadcast %cst_7 : f32 to vector<16x1xf32>
    %19 = arith.addf %17, %18 : vector<16x1xf32>
    %20 = math.rsqrt %19 : vector<16x1xf32>
    %21 = vector.broadcast %20 : vector<16x1xf32> to vector<16x256xf32>
    %22 = arith.mulf %12, %21 : vector<16x256xf32>
    %23 = vector.broadcast %1 : vector<1x256xf32> to vector<16x256xf32>
    %24 = arith.mulf %22, %23 : vector<16x256xf32>
    %25 = vector.broadcast %2 : vector<1x256xf32> to vector<16x256xf32>
    %26 = arith.addf %24, %25 : vector<16x256xf32>
    %27 = arith.truncf %26 : vector<16x256xf32> to vector<16x256xbf16>
    %c0_8 = arith.constant 0 : index
    %c0_9 = arith.constant 0 : index
    %28 = vector.load %arg3[%c0_8, %c0_9] : memref<256x288xbf16, #tpu.memory_space<vmem>>, vector<256x288xbf16>
    %cst_10 = arith.constant dense<0.000000e+00> : vector<16x288xf32>
    %29 = tpu.matmul %27, %28, %cst_10 {dimension_numbers = #tpu.dot_dimension_numbers<[1], [0], [0], [1], [0, 0, 1, 1], [], []>} : vector<16x256xbf16>, vector<256x288xbf16>, vector<16x288xf32> -> vector<16x288xf32>
    %30 = vector.shape_cast %29 : vector<16x288xf32> to vector<2x8x288xf32>
    %31 = vector.extract_strided_slice %30 {offsets = [0, 0, 0], sizes = [2, 8, 144], strides = [1, 1, 1]} : vector<2x8x288xf32> to vector<2x8x144xf32>
    %32 = vector.extract_strided_slice %30 {offsets = [0, 0, 144], sizes = [2, 8, 144], strides = [1, 1, 1]} : vector<2x8x288xf32> to vector<2x8x144xf32>
    %cst_11 = arith.constant 0.000000e+00 : f32
    %33 = vector.broadcast %cst_11 : f32 to vector<2x8x144xf32>
    %cst_12 = arith.constant 0.000000e+00 : f32
    %34 = vector.broadcast %cst_12 : f32 to vector<2x8x144xf32>
    %c0_13 = arith.constant 0 : index
    %c0_14 = arith.constant 0 : index
    %c0_15 = arith.constant 0 : index
    %35 = vector.load %arg4[%c0_13, %c0_14, %c0_15] : memref<8x8x144xf32, #tpu.memory_space<vmem>>, vector<1x8x144xf32>
    %36 = vector.shape_cast %35 : vector<1x8x144xf32> to vector<8x144xf32>
    %c0_16 = arith.constant 0 : index
    %c0_17 = arith.constant 0 : index
    %c0_18 = arith.constant 0 : index
    %37 = vector.load %arg5[%c0_16, %c0_17, %c0_18] : memref<8x8x144xf32, #tpu.memory_space<vmem>>, vector<1x8x144xf32>
    %38 = vector.shape_cast %37 : vector<1x8x144xf32> to vector<8x144xf32>
    %39 = vector.extract_strided_slice %31 {offsets = [0, 0, 0], sizes = [2, 1, 144], strides = [1, 1, 1]} : vector<2x8x144xf32> to vector<2x1x144xf32>
    %40 = vector.extract_strided_slice %32 {offsets = [0, 0, 0], sizes = [2, 1, 144], strides = [1, 1, 1]} : vector<2x8x144xf32> to vector<2x1x144xf32>
    %41 = vector.shape_cast %36 : vector<8x144xf32> to vector<1x8x144xf32>
    %42 = vector.broadcast %39 : vector<2x1x144xf32> to vector<2x8x144xf32>
    %43 = vector.broadcast %41 : vector<1x8x144xf32> to vector<2x8x144xf32>
    %44 = arith.mulf %42, %43 : vector<2x8x144xf32>
    %45 = arith.addf %33, %44 : vector<2x8x144xf32>
    %46 = vector.shape_cast %38 : vector<8x144xf32> to vector<1x8x144xf32>
    %47 = vector.broadcast %40 : vector<2x1x144xf32> to vector<2x8x144xf32>
    %48 = vector.broadcast %46 : vector<1x8x144xf32> to vector<2x8x144xf32>
    %49 = arith.mulf %47, %48 : vector<2x8x144xf32>
    %50 = arith.subf %45, %49 : vector<2x8x144xf32>
    %51 = vector.shape_cast %38 : vector<8x144xf32> to vector<1x8x144xf32>
    %52 = vector.broadcast %39 : vector<2x1x144xf32> to vector<2x8x144xf32>
    %53 = vector.broadcast %51 : vector<1x8x144xf32> to vector<2x8x144xf32>
    %54 = arith.mulf %52, %53 : vector<2x8x144xf32>
    %55 = arith.addf %34, %54 : vector<2x8x144xf32>
    %56 = vector.shape_cast %36 : vector<8x144xf32> to vector<1x8x144xf32>
    %57 = vector.broadcast %40 : vector<2x1x144xf32> to vector<2x8x144xf32>
    %58 = vector.broadcast %56 : vector<1x8x144xf32> to vector<2x8x144xf32>
    %59 = arith.mulf %57, %58 : vector<2x8x144xf32>
    %60 = arith.addf %55, %59 : vector<2x8x144xf32>
    %c1 = arith.constant 1 : index
    %c0_19 = arith.constant 0 : index
    %c0_20 = arith.constant 0 : index
    %61 = vector.load %arg4[%c1, %c0_19, %c0_20] : memref<8x8x144xf32, #tpu.memory_space<vmem>>, vector<1x8x144xf32>
    %62 = vector.shape_cast %61 : vector<1x8x144xf32> to vector<8x144xf32>
    %c1_21 = arith.constant 1 : index
    %c0_22 = arith.constant 0 : index
    %c0_23 = arith.constant 0 : index
    %63 = vector.load %arg5[%c1_21, %c0_22, %c0_23] : memref<8x8x144xf32, #tpu.memory_space<vmem>>, vector<1x8x144xf32>
    %64 = vector.shape_cast %63 : vector<1x8x144xf32> to vector<8x144xf32>
    %65 = vector.extract_strided_slice %31 {offsets = [0, 1, 0], sizes = [2, 1, 144], strides = [1, 1, 1]} : vector<2x8x144xf32> to vector<2x1x144xf32>
    %66 = vector.extract_strided_slice %32 {offsets = [0, 1, 0], sizes = [2, 1, 144], strides = [1, 1, 1]} : vector<2x8x144xf32> to vector<2x1x144xf32>
    %67 = vector.shape_cast %62 : vector<8x144xf32> to vector<1x8x144xf32>
    %68 = vector.broadcast %65 : vector<2x1x144xf32> to vector<2x8x144xf32>
    %69 = vector.broadcast %67 : vector<1x8x144xf32> to vector<2x8x144xf32>
    %70 = arith.mulf %68, %69 : vector<2x8x144xf32>
    %71 = arith.addf %50, %70 : vector<2x8x144xf32>
    %72 = vector.shape_cast %64 : vector<8x144xf32> to vector<1x8x144xf32>
    %73 = vector.broadcast %66 : vector<2x1x144xf32> to vector<2x8x144xf32>
    %74 = vector.broadcast %72 : vector<1x8x144xf32> to vector<2x8x144xf32>
    %75 = arith.mulf %73, %74 : vector<2x8x144xf32>
    %76 = arith.subf %71, %75 : vector<2x8x144xf32>
    %77 = vector.shape_cast %64 : vector<8x144xf32> to vector<1x8x144xf32>
    %78 = vector.broadcast %65 : vector<2x1x144xf32> to vector<2x8x144xf32>
    %79 = vector.broadcast %77 : vector<1x8x144xf32> to vector<2x8x144xf32>
    %80 = arith.mulf %78, %79 : vector<2x8x144xf32>
    %81 = arith.addf %60, %80 : vector<2x8x144xf32>
    %82 = vector.shape_cast %62 : vector<8x144xf32> to vector<1x8x144xf32>
    %83 = vector.broadcast %66 : vector<2x1x144xf32> to vector<2x8x144xf32>
    %84 = vector.broadcast %82 : vector<1x8x144xf32> to vector<2x8x144xf32>
    %85 = arith.mulf %83, %84 : vector<2x8x144xf32>
    %86 = arith.addf %81, %85 : vector<2x8x144xf32>
    %c2 = arith.constant 2 : index
    %c0_24 = arith.constant 0 : index
    %c0_25 = arith.constant 0 : index
    %87 = vector.load %arg4[%c2, %c0_24, %c0_25] : memref<8x8x144xf32, #tpu.memory_space<vmem>>, vector<1x8x144xf32>
    %88 = vector.shape_cast %87 : vector<1x8x144xf32> to vector<8x144xf32>
    %c2_26 = arith.constant 2 : index
    %c0_27 = arith.constant 0 : index
    %c0_28 = arith.constant 0 : index
    %89 = vector.load %arg5[%c2_26, %c0_27, %c0_28] : memref<8x8x144xf32, #tpu.memory_space<vmem>>, vector<1x8x144xf32>
    %90 = vector.shape_cast %89 : vector<1x8x144xf32> to vector<8x144xf32>
    %91 = vector.extract_strided_slice %31 {offsets = [0, 2, 0], sizes = [2, 1, 144], strides = [1, 1, 1]} : vector<2x8x144xf32> to vector<2x1x144xf32>
    %92 = vector.extract_strided_slice %32 {offsets = [0, 2, 0], sizes = [2, 1, 144], strides = [1, 1, 1]} : vector<2x8x144xf32> to vector<2x1x144xf32>
    %93 = vector.shape_cast %88 : vector<8x144xf32> to vector<1x8x144xf32>
    %94 = vector.broadcast %91 : vector<2x1x144xf32> to vector<2x8x144xf32>
    %95 = vector.broadcast %93 : vector<1x8x144xf32> to vector<2x8x144xf32>
    %96 = arith.mulf %94, %95 : vector<2x8x144xf32>
    %97 = arith.addf %76, %96 : vector<2x8x144xf32>
    %98 = vector.shape_cast %90 : vector<8x144xf32> to vector<1x8x144xf32>
    %99 = vector.broadcast %92 : vector<2x1x144xf32> to vector<2x8x144xf32>
    %100 = vector.broadcast %98 : vector<1x8x144xf32> to vector<2x8x144xf32>
    %101 = arith.mulf %99, %100 : vector<2x8x144xf32>
    %102 = arith.subf %97, %101 : vector<2x8x144xf32>
    %103 = vector.shape_cast %90 : vector<8x144xf32> to vector<1x8x144xf32>
    %104 = vector.broadcast %91 : vector<2x1x144xf32> to vector<2x8x144xf32>
    %105 = vector.broadcast %103 : vector<1x8x144xf32> to vector<2x8x144xf32>
    %106 = arith.mulf %104, %105 : vector<2x8x144xf32>
    %107 = arith.addf %86, %106 : vector<2x8x144xf32>
    %108 = vector.shape_cast %88 : vector<8x144xf32> to vector<1x8x144xf32>
    %109 = vector.broadcast %92 : vector<2x1x144xf32> to vector<2x8x144xf32>
    %110 = vector.broadcast %108 : vector<1x8x144xf32> to vector<2x8x144xf32>
    %111 = arith.mulf %109, %110 : vector<2x8x144xf32>
    %112 = arith.addf %107, %111 : vector<2x8x144xf32>
    %c3 = arith.constant 3 : index
    %c0_29 = arith.constant 0 : index
    %c0_30 = arith.constant 0 : index
    %113 = vector.load %arg4[%c3, %c0_29, %c0_30] : memref<8x8x144xf32, #tpu.memory_space<vmem>>, vector<1x8x144xf32>
    %114 = vector.shape_cast %113 : vector<1x8x144xf32> to vector<8x144xf32>
    %c3_31 = arith.constant 3 : index
    %c0_32 = arith.constant 0 : index
    %c0_33 = arith.constant 0 : index
    %115 = vector.load %arg5[%c3_31, %c0_32, %c0_33] : memref<8x8x144xf32, #tpu.memory_space<vmem>>, vector<1x8x144xf32>
    %116 = vector.shape_cast %115 : vector<1x8x144xf32> to vector<8x144xf32>
    %117 = vector.extract_strided_slice %31 {offsets = [0, 3, 0], sizes = [2, 1, 144], strides = [1, 1, 1]} : vector<2x8x144xf32> to vector<2x1x144xf32>
    %118 = vector.extract_strided_slice %32 {offsets = [0, 3, 0], sizes = [2, 1, 144], strides = [1, 1, 1]} : vector<2x8x144xf32> to vector<2x1x144xf32>
    %119 = vector.shape_cast %114 : vector<8x144xf32> to vector<1x8x144xf32>
    %120 = vector.broadcast %117 : vector<2x1x144xf32> to vector<2x8x144xf32>
    %121 = vector.broadcast %119 : vector<1x8x144xf32> to vector<2x8x144xf32>
    %122 = arith.mulf %120, %121 : vector<2x8x144xf32>
    %123 = arith.addf %102, %122 : vector<2x8x144xf32>
    %124 = vector.shape_cast %116 : vector<8x144xf32> to vector<1x8x144xf32>
    %125 = vector.broadcast %118 : vector<2x1x144xf32> to vector<2x8x144xf32>
    %126 = vector.broadcast %124 : vector<1x8x144xf32> to vector<2x8x144xf32>
    %127 = arith.mulf %125, %126 : vector<2x8x144xf32>
    %128 = arith.subf %123, %127 : vector<2x8x144xf32>
    %129 = vector.shape_cast %116 : vector<8x144xf32> to vector<1x8x144xf32>
    %130 = vector.broadcast %117 : vector<2x1x144xf32> to vector<2x8x144xf32>
    %131 = vector.broadcast %129 : vector<1x8x144xf32> to vector<2x8x144xf32>
    %132 = arith.mulf %130, %131 : vector<2x8x144xf32>
    %133 = arith.addf %112, %132 : vector<2x8x144xf32>
    %134 = vector.shape_cast %114 : vector<8x144xf32> to vector<1x8x144xf32>
    %135 = vector.broadcast %118 : vector<2x1x144xf32> to vector<2x8x144xf32>
    %136 = vector.broadcast %134 : vector<1x8x144xf32> to vector<2x8x144xf32>
    %137 = arith.mulf %135, %136 : vector<2x8x144xf32>
    %138 = arith.addf %133, %137 : vector<2x8x144xf32>
    %c4 = arith.constant 4 : index
    %c0_34 = arith.constant 0 : index
    %c0_35 = arith.constant 0 : index
    %139 = vector.load %arg4[%c4, %c0_34, %c0_35] : memref<8x8x144xf32, #tpu.memory_space<vmem>>, vector<1x8x144xf32>
    %140 = vector.shape_cast %139 : vector<1x8x144xf32> to vector<8x144xf32>
    %c4_36 = arith.constant 4 : index
    %c0_37 = arith.constant 0 : index
    %c0_38 = arith.constant 0 : index
    %141 = vector.load %arg5[%c4_36, %c0_37, %c0_38] : memref<8x8x144xf32, #tpu.memory_space<vmem>>, vector<1x8x144xf32>
    %142 = vector.shape_cast %141 : vector<1x8x144xf32> to vector<8x144xf32>
    %143 = vector.extract_strided_slice %31 {offsets = [0, 4, 0], sizes = [2, 1, 144], strides = [1, 1, 1]} : vector<2x8x144xf32> to vector<2x1x144xf32>
    %144 = vector.extract_strided_slice %32 {offsets = [0, 4, 0], sizes = [2, 1, 144], strides = [1, 1, 1]} : vector<2x8x144xf32> to vector<2x1x144xf32>
    %145 = vector.shape_cast %140 : vector<8x144xf32> to vector<1x8x144xf32>
    %146 = vector.broadcast %143 : vector<2x1x144xf32> to vector<2x8x144xf32>
    %147 = vector.broadcast %145 : vector<1x8x144xf32> to vector<2x8x144xf32>
    %148 = arith.mulf %146, %147 : vector<2x8x144xf32>
    %149 = arith.addf %128, %148 : vector<2x8x144xf32>
    %150 = vector.shape_cast %142 : vector<8x144xf32> to vector<1x8x144xf32>
    %151 = vector.broadcast %144 : vector<2x1x144xf32> to vector<2x8x144xf32>
    %152 = vector.broadcast %150 : vector<1x8x144xf32> to vector<2x8x144xf32>
    %153 = arith.mulf %151, %152 : vector<2x8x144xf32>
    %154 = arith.subf %149, %153 : vector<2x8x144xf32>
    %155 = vector.shape_cast %142 : vector<8x144xf32> to vector<1x8x144xf32>
    %156 = vector.broadcast %143 : vector<2x1x144xf32> to vector<2x8x144xf32>
    %157 = vector.broadcast %155 : vector<1x8x144xf32> to vector<2x8x144xf32>
    %158 = arith.mulf %156, %157 : vector<2x8x144xf32>
    %159 = arith.addf %138, %158 : vector<2x8x144xf32>
    %160 = vector.shape_cast %140 : vector<8x144xf32> to vector<1x8x144xf32>
    %161 = vector.broadcast %144 : vector<2x1x144xf32> to vector<2x8x144xf32>
    %162 = vector.broadcast %160 : vector<1x8x144xf32> to vector<2x8x144xf32>
    %163 = arith.mulf %161, %162 : vector<2x8x144xf32>
    %164 = arith.addf %159, %163 : vector<2x8x144xf32>
    %c5 = arith.constant 5 : index
    %c0_39 = arith.constant 0 : index
    %c0_40 = arith.constant 0 : index
    %165 = vector.load %arg4[%c5, %c0_39, %c0_40] : memref<8x8x144xf32, #tpu.memory_space<vmem>>, vector<1x8x144xf32>
    %166 = vector.shape_cast %165 : vector<1x8x144xf32> to vector<8x144xf32>
    %c5_41 = arith.constant 5 : index
    %c0_42 = arith.constant 0 : index
    %c0_43 = arith.constant 0 : index
    %167 = vector.load %arg5[%c5_41, %c0_42, %c0_43] : memref<8x8x144xf32, #tpu.memory_space<vmem>>, vector<1x8x144xf32>
    %168 = vector.shape_cast %167 : vector<1x8x144xf32> to vector<8x144xf32>
    %169 = vector.extract_strided_slice %31 {offsets = [0, 5, 0], sizes = [2, 1, 144], strides = [1, 1, 1]} : vector<2x8x144xf32> to vector<2x1x144xf32>
    %170 = vector.extract_strided_slice %32 {offsets = [0, 5, 0], sizes = [2, 1, 144], strides = [1, 1, 1]} : vector<2x8x144xf32> to vector<2x1x144xf32>
    %171 = vector.shape_cast %166 : vector<8x144xf32> to vector<1x8x144xf32>
    %172 = vector.broadcast %169 : vector<2x1x144xf32> to vector<2x8x144xf32>
    %173 = vector.broadcast %171 : vector<1x8x144xf32> to vector<2x8x144xf32>
    %174 = arith.mulf %172, %173 : vector<2x8x144xf32>
    %175 = arith.addf %154, %174 : vector<2x8x144xf32>
    %176 = vector.shape_cast %168 : vector<8x144xf32> to vector<1x8x144xf32>
    %177 = vector.broadcast %170 : vector<2x1x144xf32> to vector<2x8x144xf32>
    %178 = vector.broadcast %176 : vector<1x8x144xf32> to vector<2x8x144xf32>
    %179 = arith.mulf %177, %178 : vector<2x8x144xf32>
    %180 = arith.subf %175, %179 : vector<2x8x144xf32>
    %181 = vector.shape_cast %168 : vector<8x144xf32> to vector<1x8x144xf32>
    %182 = vector.broadcast %169 : vector<2x1x144xf32> to vector<2x8x144xf32>
    %183 = vector.broadcast %181 : vector<1x8x144xf32> to vector<2x8x144xf32>
    %184 = arith.mulf %182, %183 : vector<2x8x144xf32>
    %185 = arith.addf %164, %184 : vector<2x8x144xf32>
    %186 = vector.shape_cast %166 : vector<8x144xf32> to vector<1x8x144xf32>
    %187 = vector.broadcast %170 : vector<2x1x144xf32> to vector<2x8x144xf32>
    %188 = vector.broadcast %186 : vector<1x8x144xf32> to vector<2x8x144xf32>
    %189 = arith.mulf %187, %188 : vector<2x8x144xf32>
    %190 = arith.addf %185, %189 : vector<2x8x144xf32>
    %c6 = arith.constant 6 : index
    %c0_44 = arith.constant 0 : index
    %c0_45 = arith.constant 0 : index
    %191 = vector.load %arg4[%c6, %c0_44, %c0_45] : memref<8x8x144xf32, #tpu.memory_space<vmem>>, vector<1x8x144xf32>
    %192 = vector.shape_cast %191 : vector<1x8x144xf32> to vector<8x144xf32>
    %c6_46 = arith.constant 6 : index
    %c0_47 = arith.constant 0 : index
    %c0_48 = arith.constant 0 : index
    %193 = vector.load %arg5[%c6_46, %c0_47, %c0_48] : memref<8x8x144xf32, #tpu.memory_space<vmem>>, vector<1x8x144xf32>
    %194 = vector.shape_cast %193 : vector<1x8x144xf32> to vector<8x144xf32>
    %195 = vector.extract_strided_slice %31 {offsets = [0, 6, 0], sizes = [2, 1, 144], strides = [1, 1, 1]} : vector<2x8x144xf32> to vector<2x1x144xf32>
    %196 = vector.extract_strided_slice %32 {offsets = [0, 6, 0], sizes = [2, 1, 144], strides = [1, 1, 1]} : vector<2x8x144xf32> to vector<2x1x144xf32>
    %197 = vector.shape_cast %192 : vector<8x144xf32> to vector<1x8x144xf32>
    %198 = vector.broadcast %195 : vector<2x1x144xf32> to vector<2x8x144xf32>
    %199 = vector.broadcast %197 : vector<1x8x144xf32> to vector<2x8x144xf32>
    %200 = arith.mulf %198, %199 : vector<2x8x144xf32>
    %201 = arith.addf %180, %200 : vector<2x8x144xf32>
    %202 = vector.shape_cast %194 : vector<8x144xf32> to vector<1x8x144xf32>
    %203 = vector.broadcast %196 : vector<2x1x144xf32> to vector<2x8x144xf32>
    %204 = vector.broadcast %202 : vector<1x8x144xf32> to vector<2x8x144xf32>
    %205 = arith.mulf %203, %204 : vector<2x8x144xf32>
    %206 = arith.subf %201, %205 : vector<2x8x144xf32>
    %207 = vector.shape_cast %194 : vector<8x144xf32> to vector<1x8x144xf32>
    %208 = vector.broadcast %195 : vector<2x1x144xf32> to vector<2x8x144xf32>
    %209 = vector.broadcast %207 : vector<1x8x144xf32> to vector<2x8x144xf32>
    %210 = arith.mulf %208, %209 : vector<2x8x144xf32>
    %211 = arith.addf %190, %210 : vector<2x8x144xf32>
    %212 = vector.shape_cast %192 : vector<8x144xf32> to vector<1x8x144xf32>
    %213 = vector.broadcast %196 : vector<2x1x144xf32> to vector<2x8x144xf32>
    %214 = vector.broadcast %212 : vector<1x8x144xf32> to vector<2x8x144xf32>
    %215 = arith.mulf %213, %214 : vector<2x8x144xf32>
    %216 = arith.addf %211, %215 : vector<2x8x144xf32>
    %c7 = arith.constant 7 : index
    %c0_49 = arith.constant 0 : index
    %c0_50 = arith.constant 0 : index
    %217 = vector.load %arg4[%c7, %c0_49, %c0_50] : memref<8x8x144xf32, #tpu.memory_space<vmem>>, vector<1x8x144xf32>
    %218 = vector.shape_cast %217 : vector<1x8x144xf32> to vector<8x144xf32>
    %c7_51 = arith.constant 7 : index
    %c0_52 = arith.constant 0 : index
    %c0_53 = arith.constant 0 : index
    %219 = vector.load %arg5[%c7_51, %c0_52, %c0_53] : memref<8x8x144xf32, #tpu.memory_space<vmem>>, vector<1x8x144xf32>
    %220 = vector.shape_cast %219 : vector<1x8x144xf32> to vector<8x144xf32>
    %221 = vector.extract_strided_slice %31 {offsets = [0, 7, 0], sizes = [2, 1, 144], strides = [1, 1, 1]} : vector<2x8x144xf32> to vector<2x1x144xf32>
    %222 = vector.extract_strided_slice %32 {offsets = [0, 7, 0], sizes = [2, 1, 144], strides = [1, 1, 1]} : vector<2x8x144xf32> to vector<2x1x144xf32>
    %223 = vector.shape_cast %218 : vector<8x144xf32> to vector<1x8x144xf32>
    %224 = vector.broadcast %221 : vector<2x1x144xf32> to vector<2x8x144xf32>
    %225 = vector.broadcast %223 : vector<1x8x144xf32> to vector<2x8x144xf32>
    %226 = arith.mulf %224, %225 : vector<2x8x144xf32>
    %227 = arith.addf %206, %226 : vector<2x8x144xf32>
    %228 = vector.shape_cast %220 : vector<8x144xf32> to vector<1x8x144xf32>
    %229 = vector.broadcast %222 : vector<2x1x144xf32> to vector<2x8x144xf32>
    %230 = vector.broadcast %228 : vector<1x8x144xf32> to vector<2x8x144xf32>
    %231 = arith.mulf %229, %230 : vector<2x8x144xf32>
    %232 = arith.subf %227, %231 : vector<2x8x144xf32>
    %233 = vector.shape_cast %220 : vector<8x144xf32> to vector<1x8x144xf32>
    %234 = vector.broadcast %221 : vector<2x1x144xf32> to vector<2x8x144xf32>
    %235 = vector.broadcast %233 : vector<1x8x144xf32> to vector<2x8x144xf32>
    %236 = arith.mulf %234, %235 : vector<2x8x144xf32>
    %237 = arith.addf %216, %236 : vector<2x8x144xf32>
    %238 = vector.shape_cast %218 : vector<8x144xf32> to vector<1x8x144xf32>
    %239 = vector.broadcast %222 : vector<2x1x144xf32> to vector<2x8x144xf32>
    %240 = vector.broadcast %238 : vector<1x8x144xf32> to vector<2x8x144xf32>
    %241 = arith.mulf %239, %240 : vector<2x8x144xf32>
    %242 = arith.addf %237, %241 : vector<2x8x144xf32>
    %243 = tpu.concatenate %232, %242 in 2 : vector<2x8x144xf32>, vector<2x8x144xf32> -> vector<2x8x288xf32>
    %244 = vector.shape_cast %243 : vector<2x8x288xf32> to vector<16x288xf32>
    %245 = arith.truncf %244 : vector<16x288xf32> to vector<16x288xbf16>
    %c0_54 = arith.constant 0 : index
    %c0_55 = arith.constant 0 : index
    %246 = vector.load %arg6[%c0_54, %c0_55] : memref<288x256xbf16, #tpu.memory_space<vmem>>, vector<288x256xbf16>
    %cst_56 = arith.constant dense<0.000000e+00> : vector<16x256xf32>
    %247 = tpu.matmul %245, %246, %cst_56 {dimension_numbers = #tpu.dot_dimension_numbers<[1], [0], [0], [1], [0, 0, 1, 1], [], []>} : vector<16x288xbf16>, vector<288x256xbf16>, vector<16x256xf32> -> vector<16x256xf32>
    %c0_57 = arith.constant 0 : index
    %c0_58 = arith.constant 0 : index
    %248 = vector.load %arg7[%c0_57, %c0_58] : memref<8x2xf32, #tpu.memory_space<vmem>>, vector<8x2xf32>
    %249 = vector.extract_strided_slice %248 {offsets = [0, 0], sizes = [8, 1], strides = [1, 1]} : vector<8x2xf32> to vector<8x1xf32>
    %250 = vector.extract_strided_slice %248 {offsets = [0, 1], sizes = [8, 1], strides = [1, 1]} : vector<8x2xf32> to vector<8x1xf32>
    %251 = vector.shape_cast %247 : vector<16x256xf32> to vector<2x8x256xf32>
    %252 = vector.shape_cast %249 : vector<8x1xf32> to vector<1x8x1xf32>
    %253 = vector.broadcast %252 : vector<1x8x1xf32> to vector<2x8x256xf32>
    %254 = arith.addf %251, %253 : vector<2x8x256xf32>
    %c0_59 = arith.constant 0 : index
    %c0_60 = arith.constant 0 : index
    %255 = vector.load %arg8[%c0_59, %c0_60] : memref<8x8xbf16, #tpu.memory_space<vmem>>, vector<8x8xbf16>
    %256 = vector.extract_strided_slice %27 {offsets = [0, 0], sizes = [8, 256], strides = [1, 1]} : vector<16x256xbf16> to vector<8x256xbf16>
    %cst_61 = arith.constant dense<0.000000e+00> : vector<8x256xf32>
    %257 = tpu.matmul %255, %256, %cst_61 {dimension_numbers = #tpu.dot_dimension_numbers<[1], [0], [0], [1], [0, 0, 1, 1], [], []>} : vector<8x8xbf16>, vector<8x256xbf16>, vector<8x256xf32> -> vector<8x256xf32>
    %258 = vector.extract_strided_slice %27 {offsets = [8, 0], sizes = [8, 256], strides = [1, 1]} : vector<16x256xbf16> to vector<8x256xbf16>
    %cst_62 = arith.constant dense<0.000000e+00> : vector<8x256xf32>
    %259 = tpu.matmul %255, %258, %cst_62 {dimension_numbers = #tpu.dot_dimension_numbers<[1], [0], [0], [1], [0, 0, 1, 1], [], []>} : vector<8x8xbf16>, vector<8x256xbf16>, vector<8x256xf32> -> vector<8x256xf32>
    %260 = vector.shape_cast %257 : vector<8x256xf32> to vector<1x8x256xf32>
    %261 = vector.shape_cast %259 : vector<8x256xf32> to vector<1x8x256xf32>
    %262 = tpu.concatenate %260, %261 in 0 : vector<1x8x256xf32>, vector<1x8x256xf32> -> vector<2x8x256xf32>
    %263 = vector.shape_cast %250 : vector<8x1xf32> to vector<1x8x1xf32>
    %264 = vector.broadcast %263 : vector<1x8x1xf32> to vector<2x8x256xf32>
    %265 = arith.addf %262, %264 : vector<2x8x256xf32>
    %266 = arith.addf %254, %265 : vector<2x8x256xf32>
    %cst_63 = arith.constant 5.000000e-01 : f32
    %267 = vector.broadcast %cst_63 : f32 to vector<2x8x256xf32>
    %268 = arith.mulf %267, %266 : vector<2x8x256xf32>
    %cst_64 = arith.constant 4.471500e-02 : f32
    %269 = vector.broadcast %cst_64 : f32 to vector<2x8x256xf32>
    %270 = arith.mulf %269, %266 : vector<2x8x256xf32>
    %271 = arith.mulf %270, %266 : vector<2x8x256xf32>
    %272 = arith.mulf %271, %266 : vector<2x8x256xf32>
    %273 = arith.addf %266, %272 : vector<2x8x256xf32>
    %cst_65 = arith.constant 0.797884583 : f32
    %274 = vector.broadcast %cst_65 : f32 to vector<2x8x256xf32>
    %275 = arith.mulf %274, %273 : vector<2x8x256xf32>
    %276 = math.tanh %275 : vector<2x8x256xf32>
    %cst_66 = arith.constant 1.000000e+00 : f32
    %277 = vector.broadcast %cst_66 : f32 to vector<2x8x256xf32>
    %278 = arith.addf %277, %276 : vector<2x8x256xf32>
    %279 = arith.mulf %268, %278 : vector<2x8x256xf32>
    %280 = vector.shape_cast %279 : vector<2x8x256xf32> to vector<16x256xf32>
    %cst_67 = arith.constant dense<0.000000e+00> : vector<16xf32>
    %281 = vector.multi_reduction <add>, %280, %cst_67 [1] : vector<16x256xf32> to vector<16xf32>
    %282 = vector.shape_cast %281 : vector<16xf32> to vector<16x1xf32>
    %cst_68 = arith.constant 3.906250e-03 : f32
    %283 = vector.broadcast %cst_68 : f32 to vector<16x1xf32>
    %284 = arith.mulf %282, %283 : vector<16x1xf32>
    %285 = vector.broadcast %284 : vector<16x1xf32> to vector<16x256xf32>
    %286 = arith.subf %280, %285 : vector<16x256xf32>
    %287 = arith.mulf %286, %286 : vector<16x256xf32>
    %cst_69 = arith.constant dense<0.000000e+00> : vector<16xf32>
    %288 = vector.multi_reduction <add>, %287, %cst_69 [1] : vector<16x256xf32> to vector<16xf32>
    %289 = vector.shape_cast %288 : vector<16xf32> to vector<16x1xf32>
    %cst_70 = arith.constant 3.906250e-03 : f32
    %290 = vector.broadcast %cst_70 : f32 to vector<16x1xf32>
    %291 = arith.mulf %289, %290 : vector<16x1xf32>
    %cst_71 = arith.constant 9.99999997E-7 : f32
    %292 = vector.broadcast %cst_71 : f32 to vector<16x1xf32>
    %293 = arith.addf %291, %292 : vector<16x1xf32>
    %294 = math.rsqrt %293 : vector<16x1xf32>
    %295 = vector.broadcast %294 : vector<16x1xf32> to vector<16x256xf32>
    %296 = arith.mulf %286, %295 : vector<16x256xf32>
    %297 = vector.broadcast %3 : vector<1x256xf32> to vector<16x256xf32>
    %298 = arith.mulf %296, %297 : vector<16x256xf32>
    %299 = vector.broadcast %4 : vector<1x256xf32> to vector<16x256xf32>
    %300 = arith.addf %298, %299 : vector<16x256xf32>
    %301 = vector.shape_cast %300 : vector<16x256xf32> to vector<2x8x256xf32>
    %c0_72 = arith.constant 0 : index
    %c0_73 = arith.constant 0 : index
    %c0_74 = arith.constant 0 : index
    %302 = vector.load %arg9[%c0_72, %c0_73, %c0_74] : memref<2x8x256xf32, #tpu.memory_space<vmem>>, vector<2x8x256xf32>
    tpu.vector_store %arg9[%c0_72, %c0_73, %c0_74], %301 {strides = array<i32>} : memref<2x8x256xf32, #tpu.memory_space<vmem>>, vector<2x8x256xf32>,
    return
  }
  func.func @transform_0(%arg0: i32) -> (i32, i32, i32) {
    %c0_i32 = arith.constant 0 : i32
    %c0_i32_0 = arith.constant 0 : i32
    %c0_i32_1 = arith.constant 0 : i32
    return %arg0, %c0_i32, %c0_i32_0 : i32, i32, i32
  }
  func.func @transform_1(%arg0: i32) -> (i32, i32) {
    %c0_i32 = arith.constant 0 : i32
    %c0_i32_0 = arith.constant 0 : i32
    %c0_i32_1 = arith.constant 0 : i32
    return %c0_i32, %c0_i32_0 : i32, i32
  }
  func.func @transform_2(%arg0: i32) -> (i32, i32) {
    %c0_i32 = arith.constant 0 : i32
    %c0_i32_0 = arith.constant 0 : i32
    %c0_i32_1 = arith.constant 0 : i32
    return %c0_i32, %c0_i32_0 : i32, i32
  }
  func.func @transform_3(%arg0: i32) -> (i32, i32, i32) {
    %c0_i32 = arith.constant 0 : i32
    %c0_i32_0 = arith.constant 0 : i32
    %c0_i32_1 = arith.constant 0 : i32
    %c0_i32_2 = arith.constant 0 : i32
    return %c0_i32, %c0_i32_0, %c0_i32_1 : i32, i32, i32
  }
  func.func @transform_4(%arg0: i32) -> (i32, i32, i32) {
    %c0_i32 = arith.constant 0 : i32
    %c0_i32_0 = arith.constant 0 : i32
    %c0_i32_1 = arith.constant 0 : i32
    %c0_i32_2 = arith.constant 0 : i32
    return %c0_i32, %c0_i32_0, %c0_i32_1 : i32, i32, i32
  }
  func.func @transform_5(%arg0: i32) -> (i32, i32) {
    %c0_i32 = arith.constant 0 : i32
    %c0_i32_0 = arith.constant 0 : i32
    %c0_i32_1 = arith.constant 0 : i32
    return %c0_i32, %c0_i32_0 : i32, i32
  }
  func.func @transform_6(%arg0: i32) -> (i32, i32) {
    %c0_i32 = arith.constant 0 : i32
    %c0_i32_0 = arith.constant 0 : i32
    %c0_i32_1 = arith.constant 0 : i32
    return %c0_i32, %c0_i32_0 : i32, i32
  }
  func.func @transform_7(%arg0: i32) -> (i32, i32) {
    %c0_i32 = arith.constant 0 : i32
    %c0_i32_0 = arith.constant 0 : i32
    %c0_i32_1 = arith.constant 0 : i32
    return %c0_i32, %c0_i32_0 : i32, i32
  }
  func.func @transform_8(%arg0: i32) -> (i32, i32, i32) {
    %c0_i32 = arith.constant 0 : i32
    %c0_i32_0 = arith.constant 0 : i32
    %c0_i32_1 = arith.constant 0 : i32
    return %arg0, %c0_i32, %c0_i32_0 : i32, i32, i32
  }
}

</mosaic_0001>

<bundles_post_ra>
// kernel: fno_block_forward.1
= control target key start
LH: loop header
LB: loop body
LE: loop exit
PB: predicated region body
PF: predicated region fallthrough
CT: control target
= control target key end

     0   :  { %s2332_s22 = smov 16   ;;  %vm1790_vm0 = vcmask 1043456   ;;  %vm560_vm1 = vcmask 130048   ;;  %s2333_s18 = smov 112   ;;  %vm580_vm2 = vcmask 916480   ;;  %vm1685_vm3 = vcmask 261120   ;;  %s3537_s0 = inlined_call_operand.vmem [shape: f32[2,8,256], index: 0, kind: input, shape index: {}]   ;;  %s3538_s2 = inlined_call_operand.vmem [shape: bf16[256,288], index: 2, kind: input, shape index: {}]   ;;  %s3539_s5 = inlined_call_operand.vmem [shape: bf16[288,256], index: 5, kind: input, shape index: {}]   ;;  %s3540_s3 = inlined_call_operand.vmem [shape: f32[8,8,144], index: 3, kind: input, shape index: {}]   ;;  %s3541_s4 = inlined_call_operand.vmem [shape: f32[8,8,144], index: 4, kind: input, shape index: {}]   ;;  %s3542_s1 = inlined_call_operand.vmem [shape: f32[4,256], index: 1, kind: input, shape index: {}]   ;;  %s3543_s6 = inlined_call_operand.vmem [shape: f32[8,2], index: 6, kind: input, shape index: {}]   ;;  %s3544_s7 = inlined_call_operand.vmem [shape: bf16[8,8], index: 7, kind: input, shape index: {}]   ;;  %s3545_s8 = inlined_call_operand.vmem [shape: f32[2,8,256], index: 8, kind: output, shape index: {}]  }
   0x1   :  { %v31_v0 = vld [vmem:[%s3537_s0] sm:$0xff]  ;;  %v32_v1 = vld [vmem:[%s3537_s0 + $0x8] sm:$0xff]  ;;  %v33_v2 = vld [vmem:[%s3537_s0 + $0x10] sm:$0xff]  ;;  %vm1786_vm4 = vcmask 64512  }
   0x2   :  { %v35_v3 = vadd.f32 %v32_v1, %v31_v0  ;;  %v34_v4 = vld [vmem:[%s3537_s0 + $0x18] sm:$0xff]  ;;  %v2181_v6 = vld [vmem:[%s3538_s2 + $0x4] ss:$12 sps:$4 sm:$0xff]   ;;  %v2183_v7 = vld [vmem:[%s3538_s2] ss:$12 sps:$4 sm:$0xff]  }
   0x3   :  { %v38_v5 = vadd.f32 %v34_v4, %v33_v2  ;;  %434 = vmatprep.subr.bf16.mxu0 %v2181_v6  ;;  %v2184_v8 = vld [vmem:[%s3538_s2 + $0x1c] ss:$12 sps:$4 sm:$0xff]   ;;  %v2186_v9 = vld [vmem:[%s3538_s2 + $0x18] ss:$12 sps:$4 sm:$0xff]   ;;  %v2187_v10 = vld [vmem:[%s3538_s2 + $0x34] ss:$12 sps:$4 sm:$0xff]  }
   0x4   :  { %36 = vadd.xlane.f32.xlu0 %v35_v3  ;;  %435 = vmatpush1.bf16.msra.mxu0 %v2183_v7  ;;  %v2189_v11 = vld [vmem:[%s3538_s2 + $0x30] ss:$12 sps:$4 sm:$0xff]   ;;  %v2190_v12 = vld [vmem:[%s3538_s2 + $0x4c] ss:$12 sps:$4 sm:$0xff]   ;;  %v2192_v13 = vld [vmem:[%s3538_s2 + $0x48] ss:$12 sps:$4 sm:$0xff]  }
   0x5   :  { %436 = vmatprep.subr.bf16.mxu0 %v2184_v8  ;;  %v2193_v14 = vld [vmem:[%s3538_s2 + $0x64] ss:$12 sps:$4 sm:$0xff]   ;;  %v2208_v15 = vld [vmem:[%s3538_s2 + $0xc8] ss:$12 sps:$4 sm:$0xff]   ;;  %v2195_v16 = vld [vmem:[%s3538_s2 + $0x60] ss:$12 sps:$4 sm:$0xff]  }
   0x6   :  { %v2209_v17 = vld [vmem:[%s3538_s2 + $0x8] ss:$12 sps:$4 sm:$0xff]   ;;  %2138 = vmatprep.subr.bf16.mxu1 %v2208_v15  ;;  %v2198_v19 = vld [vmem:[%s3538_s2 + $0x78] ss:$12 sps:$4 sm:$0xff]   ;;  %v2201_v21 = vld [vmem:[%s3538_s2 + $0x90] ss:$12 sps:$4 sm:$0xff]  }
   0x7   :  { %v2196_v18 = vld [vmem:[%s3538_s2 + $0x7c] ss:$12 sps:$4 sm:$0xff]   ;;  %2139 = vmatpush3.bf16.msra.mxu1 %v2209_v17  ;;  %v2199_v20 = vld [vmem:[%s3538_s2 + $0x94] ss:$12 sps:$4 sm:$0xff]   ;;  %v2202_v22 = vld [vmem:[%s3538_s2 + $0xac] ss:$12 sps:$4 sm:$0xff]  }
   0x8   :  { %39 = vadd.xlane.f32.xlu0 %v38_v5  ;;  %437 = vmatpush1.bf16.msra.mxu0 %v2186_v9  ;;  %v2204_v23 = vld [vmem:[%s3538_s2 + $0xa8] ss:$12 sps:$4 sm:$0xff]   ;;  %v2205_v24 = vld [vmem:[%s3538_s2 + $0xc4] ss:$12 sps:$4 sm:$0xff]   ;;  %v2207_v25 = vld [vmem:[%s3538_s2 + $0xc0] ss:$12 sps:$4 sm:$0xff]  }
   0x9   :  { %438 = vmatprep.subr.bf16.mxu0 %v2187_v10  ;;  %v2210_v26 = vld [vmem:[%s3538_s2 + $0xdc] ss:$12 sps:$4 sm:$0xff]   ;;  %v2212_v41 = vld [vmem:[%s3538_s2 + $0xd8] ss:$12 sps:$4 sm:$0xff]   ;;  %v2213_v42 = vld [vmem:[%s3538_s2 + $0xe0] ss:$12 sps:$4 sm:$0xff]  }
   0xa   :  { %v2214_v43 = vld [vmem:[%s3538_s2 + $0x20] ss:$12 sps:$4 sm:$0xff]   ;;  %2140 = vmatprep.subr.bf16.mxu1 %v2213_v42  ;;  %v2217_v45 = vld [vmem:[%s3538_s2 + $0xf0] ss:$12 sps:$4 sm:$0xff]   ;;  %v2218_v46 = vld [vmem:[%s3538_s2 + $0xf8] ss:$12 sps:$4 sm:$0xff]  }
   0xb   :  { %2141 = vmatpush3.bf16.msra.mxu1 %v2214_v43  ;;  %v2215_v44 = vld [vmem:[%s3538_s2 + $0xf4] ss:$12 sps:$4 sm:$0xff]   ;;  %v2219_v47 = vld [vmem:[%s3538_s2 + $0x38] ss:$12 sps:$4 sm:$0xff]   ;;  %v2223_v50 = vld [vmem:[%s3538_s2 + $0x110] ss:$12 sps:$4 sm:$0xff]  }
   0xc   :  { %439 = vmatpush1.bf16.msra.mxu0 %v2189_v11  ;;  %2142 = vmatprep.subr.bf16.mxu1 %v2218_v46  ;;  %v2220_v48 = vld [vmem:[%s3538_s2 + $0x10c] ss:$12 sps:$4 sm:$0xff]   ;;  %v2222_v49 = vld [vmem:[%s3538_s2 + $0x108] ss:$12 sps:$4 sm:$0xff]   ;;  %v2224_v51 = vld [vmem:[%s3538_s2 + $0x50] ss:$12 sps:$4 sm:$0xff]  }
   0xd   :  { %440 = vmatprep.subr.bf16.mxu0 %v2190_v12  ;;  %v2225_v52 = vld [vmem:[%s3538_s2 + $0x124] ss:$12 sps:$4 sm:$0xff]   ;;  %v2227_v53 = vld [vmem:[%s3538_s2 + $0x120] ss:$12 sps:$4 sm:$0xff]   ;;  %v2228_v54 = vld [vmem:[%s3538_s2 + $0x128] ss:$12 sps:$4 sm:$0xff]  }
   0xe   :  { %v2229_v55 = vld [vmem:[%s3538_s2 + $0x68] ss:$12 sps:$4 sm:$0xff]   ;;  %v2233_v57 = vld [vmem:[%s3538_s2 + $0x140] ss:$12 sps:$4 sm:$0xff]   ;;  %v2232_v58 = vld [vmem:[%s3538_s2 + $0x138] ss:$12 sps:$4 sm:$0xff]  }
   0xf   :  { %2143 = vmatpush3.bf16.msra.mxu1 %v2219_v47  ;;  %v2230_v56 = vld [vmem:[%s3538_s2 + $0x13c] ss:$12 sps:$4 sm:$0xff]   ;;  %v2234_v59 = vld [vmem:[%s3538_s2 + $0x80] ss:$12 sps:$4 sm:$0xff]   ;;  %v2238_v61 = vld [vmem:[%s3538_s2 + $0x158] ss:$12 sps:$4 sm:$0xff]  }
  0x10   :  { %441 = vmatpush1.bf16.msra.mxu0 %v2192_v13  ;;  %2144 = vmatprep.subr.bf16.mxu1 %v2223_v50  ;;  %v2235_v60 = vld [vmem:[%s3538_s2 + $0x154] ss:$12 sps:$4 sm:$0xff]   ;;  %v2237_v62 = vld [vmem:[%s3538_s2 + $0x150] ss:$12 sps:$4 sm:$0xff]   ;;  %v2239_v63 = vld [vmem:[%s3538_s2 + $0x98] ss:$12 sps:$4 sm:$0xff]  }
  0x11   :  { %442 = vmatprep.subr.bf16.mxu0 %v2193_v14  ;;  %v2244_v3 = vld [vmem:[%s3538_s2 + $0xb0] ss:$12 sps:$4 sm:$0xff]   ;;  %v519_v5 = vld [vmem:[%s3540_s3 + $0x8] sm:$0xff]  ;;  %v518_v6 = vld [vmem:[%s3540_s3] sm:$0xff] }
  0x12   :  { %v2069_v7 = vld [vmem:[%s3540_s3 + $0x10] sm:$0xff]  ;;  %v2073_v8 = vld [vmem:[%s3540_s3 + $0x20] sm:$0xff]  ;;  %v2070_v9 = vld [vmem:[%s3540_s3 + $0x18] sm:$0xff] }
  0x13   :  { %2145 = vmatpush3.bf16.msra.mxu1 %v2224_v51  ;;  %v2077_v10 = vld [vmem:[%s3540_s3 + $0x30] sm:$0xff]  ;;  %v2074_v11 = vld [vmem:[%s3540_s3 + $0x28] sm:$0xff]  ;;  %v2081_v12 = vld [vmem:[%s3540_s3 + $0x40] sm:$0xff] }
  0x14   :  { %443 = vmatpush1.bf16.msra.mxu0 %v2195_v16  ;;  %2146 = vmatprep.subr.bf16.mxu1 %v2228_v54  ;;  %v2078_v13 = vld [vmem:[%s3540_s3 + $0x38] sm:$0xff]  ;;  %v2085_v14 = vld [vmem:[%s3540_s3 + $0x50] sm:$0xff]  ;;  %v2082_v15 = vld [vmem:[%s3540_s3 + $0x48] sm:$0xff] }
  0x15   :  { %444 = vmatprep.subr.bf16.mxu0 %v2196_v18  ;;  %v2089_v16 = vld [vmem:[%s3540_s3 + $0x60] sm:$0xff]  ;;  %v2086_v17 = vld [vmem:[%s3540_s3 + $0x58] sm:$0xff]  ;;  %v2093_v18 = vld [vmem:[%s3540_s3 + $0x70] sm:$0xff] }
  0x17   :  { %2147 = vmatpush3.bf16.msra.mxu1 %v2229_v55 }
  0x18   :  { %445 = vmatpush1.bf16.msra.mxu0 %v2198_v19  ;;  %2148 = vmatprep.subr.bf16.mxu1 %v2233_v57  ;;  %v2090_v19 = vld [vmem:[%s3540_s3 + $0x68] sm:$0xff] }
  0x19   :  { %446 = vmatprep.subr.bf16.mxu0 %v2199_v20  ;;  %v2618_v20 = vld [vmem:[%s3541_s4] sm:$0xff] }
  0x1b   :  { %2149 = vmatpush3.bf16.msra.mxu1 %v2234_v59 }
  0x1c   :  { %447 = vmatpush1.bf16.msra.mxu0 %v2201_v21  ;;  %2150 = vmatprep.subr.bf16.mxu1 %v2238_v61  ;;  %v2094_v21 = vld [vmem:[%s3540_s3 + $0x78] sm:$0xff] }
  0x1d   :  { %448 = vmatprep.subr.bf16.mxu0 %v2202_v22  ;;  %v2629_v22 = vld [vmem:[%s3541_s4 + $0x10] sm:$0xff] }
  0x1e   :  { %601 = vrot.lane.b32.xlu0 %v518_v6, %s2332_s22 }
  0x1f   :  { %2151 = vmatpush3.bf16.msra.mxu1 %v2239_v63 }
  0x20   :  { %449 = vmatpush1.bf16.msra.mxu0 %v2204_v23  ;;  %v2637_v23 = vld [vmem:[%s3541_s4 + $0x8] sm:$0xff] }
  0x21   :  { %450 = vmatprep.subr.bf16.mxu0 %v2205_v24  ;;  %v2642_v24 = vld [vmem:[%s3541_s4 + $0x20] sm:$0xff] }
  0x22   :  { %833 = vrot.lane.b32.xlu0 %v2073_v8, %s2332_s22 }
  0x24   :  { %451 = vmatpush1.bf16.msra.mxu0 %v2207_v25  ;;  %v2651_v25 = vld [vmem:[%s3541_s4 + $0x18] sm:$0xff] }
  0x25   :  { %452 = vmatprep.subr.bf16.mxu0 %v2210_v26  ;;  %v2656_v26 = vld [vmem:[%s3541_s4 + $0x30] sm:$0xff] }
  0x26   :  { %949 = vrot.lane.b32.xlu0 %v2077_v10, %s2332_s22 }
  0x28   :  { %453 = vmatpush1.bf16.msra.mxu0 %v2212_v41 }
  0x29   :  { %454 = vmatprep.subr.bf16.mxu0 %v2215_v44 }
  0x2a   :  { %1065 = vrot.lane.b32.xlu0 %v2081_v12, %s2332_s22 }
  0x2c   :  { %455 = vmatpush1.bf16.msra.mxu0 %v2217_v45 }
  0x2d   :  { %456 = vmatprep.subr.bf16.mxu0 %v2220_v48 }
  0x2e   :  { %1181 = vrot.lane.b32.xlu0 %v2085_v14, %s2332_s22 }
  0x30   :  { %457 = vmatpush1.bf16.msra.mxu0 %v2222_v49  ;;  %v30_v49 = vld [vmem:[%s3542_s1] sm:$0xff] }
  0x31   :  { %458 = vmatprep.subr.bf16.mxu0 %v2225_v52 }
  0x32   :  { %1297 = vrot.lane.b32.xlu0 %v2089_v16, %s2332_s22 }
  0x34   :  { %459 = vmatpush1.bf16.msra.mxu0 %v2227_v53 }
  0x35   :  { %460 = vmatprep.subr.bf16.mxu0 %v2230_v56 }
  0x36   :  { %1413 = vrot.lane.b32.xlu0 %v2093_v18, %s2332_s22 }
  0x38   :  { %461 = vmatpush1.bf16.msra.mxu0 %v2232_v58 }
  0x39   :  { %462 = vmatprep.subr.bf16.mxu0 %v2235_v60 }
  0x3a   :  { %556 = vrot.lane.b32.xlu0 %v2618_v20, %s2332_s22 }
  0x3c   :  { %463 = vmatpush1.bf16.msra.mxu0 %v2237_v62 }
  0x3e   :  { %674 = vrot.lane.b32.xlu0 %v2629_v22, %s2332_s22 }
  0x42   :  { %790 = vrot.lane.b32.xlu0 %v2642_v24, %s2332_s22 }
  0x46   :  { %906 = vrot.lane.b32.xlu0 %v2656_v26, %s2332_s22 }
  0x91   :  { %v37_v27 = vpop.xlane.xlu0 %36 }
  0x92   :  { %v41_v28 = vmul.f32 0.00390625, %v37_v27  ;;  %v2665_v27 = vld [vmem:[%s3541_s4 + $0x28] sm:$0xff] }
  0x94   :  { %v2456_v29 = vsub.f32 %v31_v0, %v41_v28  ;;  %v2458_v30 = vsub.f32 %v32_v1, %v41_v28  ;;  %v2240_v0 = vld [vmem:[%s3538_s2 + $0x16c] ss:$12 sps:$4 sm:$0xff]   ;;  %v2243_v1 = vld [vmem:[%s3538_s2 + $0x170] ss:$12 sps:$4 sm:$0xff]   ;;  %v2670_v28 = vld [vmem:[%s3541_s4 + $0x40] sm:$0xff] }
  0x95   :  { %v40_v31 = vpop.xlane.xlu0 %39  ;;  %464 = vmatprep.subr.bf16.mxu0 %v2240_v0  ;;  %2152 = vmatprep.subr.bf16.mxu1 %v2243_v1 }
  0x96   :  { %v42_v32 = vmul.f32 0.00390625, %v40_v31  ;;  %v47_v33 = vmul.f32 %v2456_v29, %v2456_v29  ;;  %v48_v34 = vmul.f32 %v2458_v30, %v2458_v30  ;;  %2153 = vmatpush3.bf16.msra.mxu1 %v2244_v3  ;;  %1022 = vrot.lane.b32.xlu0 %v2670_v28, %s2332_s22  ;;  %v2679_v31 = vld [vmem:[%s3541_s4 + $0x38] sm:$0xff] }
  0x98   :  { %v2464_v35 = vsub.f32 %v33_v2, %v42_v32  ;;  %v2466_v36 = vsub.f32 %v34_v4, %v42_v32  ;;  %v51_v37 = vadd.f32 %v48_v34, %v47_v33  ;;  %v2242_v2 = vld [vmem:[%s3538_s2 + $0x168] ss:$12 sps:$4 sm:$0xff]   ;;  %v2247_v4 = vld [vmem:[%s3539_s5 + $0x104] ss:$8 sps:$4 sm:$0xff]  }
  0x99   :  { %465 = vmatpush1.bf16.msra.mxu0 %v2242_v2  ;;  %v2684_v32 = vld [vmem:[%s3541_s4 + $0x50] sm:$0xff]  ;;  %v2693_v33 = vld [vmem:[%s3541_s4 + $0x48] sm:$0xff]  ;;  %v2698_v34 = vld [vmem:[%s3541_s4 + $0x60] sm:$0xff] }
  0x9a   :  { %52 = vadd.xlane.f32.xlu1 %v51_v37  ;;  %v49_v38 = vmul.f32 %v2464_v35, %v2464_v35  ;;  %v50_v39 = vmul.f32 %v2466_v36, %v2466_v36  ;;  %1732 = vmatprep.subr.bf16.mxu0 %v2247_v4  ;;  %3561 = vst [vmem:[#allocation2_spill] sm:$0xff] %v2698_v34  ;;  %v2707_v37 = vld [vmem:[%s3541_s4 + $0x58] sm:$0xff] }
  0x9b   :  { %1138 = vrot.lane.b32.xlu0 %v2684_v32, %s2332_s22 }
  0x9c   :  { %v54_v40 = vadd.f32 %v50_v39, %v49_v38  ;;  %v2714_v38 = vld [vmem:[%s3541_s4 + $0x68] sm:$0xff] }
  0x9d   :  { %3562 = vst [vmem:[#allocation3_spill] sm:$0xff] %v2714_v38 }
  0x9e   :  { %55 = vadd.xlane.f32.xlu1 %v54_v40  ;;  %v68_v40 = vlaneseq }
  0x9f   :  { %1254 = vrot.lane.b32.xlu0 %v2698_v34, %s2332_s22 }
  0xa0   :  { %v2718_v44 = vshrl.u32 %v68_v40, 7 }
  0xa2   :  { %v2721_v47 = vsub.s32 0, %v2718_v44  ;;  %v2724_v48 = vsub.s32 4, %v2718_v44  ;;  %v2730_v50 = vsub.s32 1, %v2718_v44  ;;  %v2733_v51 = vsub.s32 5, %v2718_v44 }
  0xa4   :  { %v75_v52 = vrot.slane %v30_v49, %v2724_v48  ;;  %v71_v53 = vrot.slane %v30_v49, %v2721_v47  ;;  %v97_v55 = vrot.slane %v30_v49, %v2733_v51  ;;  %v93_v56 = vrot.slane %v30_v49, %v2730_v50 }
  0xa6   :  { %v85_v58 = vrot.slane %v75_v52, %v2721_v47  ;;  %v81_v60 = vrot.slane %v71_v53, %v2721_v47  ;;  %v107_v62 = vrot.slane %v97_v55, %v2730_v50  ;;  %v103_v63 = vrot.slane %v93_v56, %v2730_v50 }
  0xaf   :  { %603 = vrot.lane.b32.xlu1 %v519_v5, %s2332_s22 }
  0xb3   :  { %717 = vrot.lane.b32.xlu1 %v2069_v7, %s2332_s22 }
  0xb7   :  { %719 = vrot.lane.b32.xlu1 %v2070_v9, %s2332_s22  ;;  %v2245_v9 = vld [vmem:[%s3539_s5 + $0x100] ss:$8 sps:$4 sm:$0xff]  }
  0xbb   :  { %835 = vrot.lane.b32.xlu1 %v2074_v11, %s2332_s22 }
  0xbf   :  { %951 = vrot.lane.b32.xlu1 %v2078_v13, %s2332_s22  ;;  %v2768_v13 = vpop.permute.xlu0 %601 }
  0xc3   :  { %1067 = vrot.lane.b32.xlu1 %v2082_v15, %s2332_s22  ;;  %v2770_v15 = vpop.permute.xlu0 %833 }
  0xc7   :  { %1183 = vrot.lane.b32.xlu1 %v2086_v17, %s2332_s22  ;;  %v2805_v56 = vpop.permute.xlu0 %949 }
  0xcb   :  { %1299 = vrot.lane.b32.xlu1 %v2090_v19, %s2332_s22 }
  0xcf   :  { %1415 = vrot.lane.b32.xlu1 %v2094_v21, %s2332_s22 }
  0xd3   :  { %558 = vrot.lane.b32.xlu1 %v2637_v23, %s2332_s22 }
  0xd7   :  { %676 = vrot.lane.b32.xlu1 %v2651_v25, %s2332_s22 }
  0xdb   :  { %792 = vrot.lane.b32.xlu1 %v2665_v27, %s2332_s22 }
  0xdf   :  { %908 = vrot.lane.b32.xlu1 %v2679_v31, %s2332_s22 }
  0xe3   :  { %1024 = vrot.lane.b32.xlu1 %v2693_v33, %s2332_s22 }
  0xe7   :  { %1140 = vrot.lane.b32.xlu1 %v2707_v37, %s2332_s22 }
  0xeb   :  { %1256 = vrot.lane.b32.xlu1 %v2714_v38, %s2332_s22 }
 0x127   :  { %v53_v39 = vpop.xlane.xlu1 %52 }
 0x128   :  { %v57_v41 = vmul.f32 0.00390625, %v53_v39 }
 0x12a   :  { %v59_v42 = vadd.f32 1e-06, %v57_v41 }
 0x12b   :  { %v56_v43 = vpop.xlane.xlu1 %55 }
 0x12c   :  { %2299 = vrsqrt.f32 %v59_v42  ;;  %v58_v45 = vmul.f32 0.00390625, %v56_v43 }
 0x12e   :  { %v60_v46 = vadd.f32 1e-06, %v58_v45 }
 0x12f   :  { %v604_v11 = vpop.permute.xlu1 %603 }
 0x130   :  { %2301 = vrsqrt.f32 %v60_v46  ;;  %v2803_v55 = vsel %vm560_vm1, %v2768_v13, %v604_v11 }
 0x133   :  { %v2766_v12 = vpop.permute.xlu1 %717 }
 0x136   :  { %v2300_v54 = vpop.eup %2299 }
 0x137   :  { %v64_v57 = vmul.f32 %v2300_v54, %v2458_v30  ;;  %v63_v59 = vmul.f32 %v2300_v54, %v2456_v29  ;;  %v720_v14 = vpop.permute.xlu1 %719  ;;  %v2799_v54 = vsub.s32 2, %v2718_v44 }
 0x139   :  { %v87_v1 = vmul.f32 %v85_v58, %v64_v57  ;;  %v86_v3 = vmul.f32 %v81_v60, %v63_v59 }
 0x13a   :  { %v2302_v61 = vpop.eup %2301 }
 0x13b   :  { %v66_v0 = vmul.f32 %v2302_v61, %v2466_v36  ;;  %v65_v2 = vmul.f32 %v2302_v61, %v2464_v35  ;;  %v109_v30 = vadd.f32 %v107_v62, %v87_v1  ;;  %v108_v7 = vadd.f32 %v103_v63, %v86_v3  ;;  %v2250_v36 = vld [vmem:[%s3539_s5 + $0x114] ss:$8 sps:$4 sm:$0xff]   ;;  %v2248_v35 = vld [vmem:[%s3539_s5 + $0x110] ss:$8 sps:$4 sm:$0xff]   ;;  %v836_v16 = vpop.permute.xlu1 %835 }
 0x13c   :  { %v2840_v3 = vsel %vm560_vm1, %v2770_v15, %v836_v16 }
 0x13d   :  { %v89_v4 = vmul.f32 %v85_v58, %v66_v0  ;;  %v88_v5 = vmul.f32 %v81_v60, %v65_v2  ;;  %v2816_v60 = vsel %vm560_vm1, %v2766_v12, %v720_v14  ;;  %v2836_v2 = vsub.s32 7, %v2718_v44 }
 0x13f   :  { %v111_v6 = vadd.f32 %v107_v62, %v89_v4  ;;  %v110_v8 = vadd.f32 %v103_v63, %v88_v5  ;;  %v952_v57 = vpop.permute.xlu1 %951  ;;  %v2826_v63 = vsub.s32 3, %v2718_v44  ;;  %3566 = vst [vmem:[#allocation7_spill] sm:$0xff] %v2836_v2  ;;  %v2842_v4 = vpop.permute.xlu0 %1065 }
 0x141   :  { %v2747_v29 = vpack.c.bf16 %v111_v6, %v109_v30  ;;  %v2752_v10 = vpack.c.bf16 %v110_v8, %v108_v7 }
 0x143   :  { %3563 = vst [vmem:[#allocation4_spill] sm:$0xff] %v2747_v29  ;;  %3564 = vst [vmem:[#allocation5_spill] sm:$0xff] %v2752_v10  ;;  %466 = vmatprep.mubr.bf16.mxu0 %v2747_v29  ;;  %509 = vmatprep.mubr.bf16.mxu1 %v2747_v29  ;;  %v1068_v5 = vpop.permute.xlu1 %1067  ;;  %v2878_v16 = vpop.permute.xlu0 %1181 }
 0x144   :  { %467 = vmatmul.mubr.bf16.vlgmr.msra.gmra.mrb[0].mxu0 %v2752_v10  ;;  %510 = vmatmul.mubr.bf16.vlgmr.msra.gmra.mrb[0].mxu1 %v2752_v10 }
 0x145   :  { %1733 = vmatpush1.bf16.msra.mxu0 %v2245_v9 }
 0x146   :  { %1734 = vmatprep.subr.bf16.mxu0 %v2250_v36  ;;  %v2864_v36 = vsel %vm560_vm1, %v2805_v56, %v952_v57  ;;  %v1069_v57 = vsel %vm560_vm1, %v2842_v4, %v1068_v5 }
 0x149   :  { %1735 = vmatpush1.bf16.msra.mxu0 %v2248_v35  ;;  %v2869_v35 = vld [vmem:[%s3541_s4 + $0x70] sm:$0xff] }
 0x14a   :  { %2134 = vmatprep.subr.msk.bf16.mxu0 %vm1790_vm0, %v2747_v29 }
 0x217   :  { %v2772_v17 = vpop.f32.mrb[0].mxu0  ;;  %v2154_v18 = vpop.f32.mrb[0].mxu1 }
 0x218   :  { %v2774_v19 = vpop.f32.mrb[1].mxu0  ;;  %v2155_v21 = vpop.f32.mrb[1].mxu1  ;;  %v2860_v9 = vrot.slane %v2772_v17, %v2836_v2 }
 0x219   :  { %v2776_v39 = vadd.f32 %v2155_v21, %v2154_v18  ;;  %v2778_v40 = vpop.f32.mrb[2].mxu0  ;;  %v2157_v41 = vpop.f32.mrb[2].mxu1  ;;  %v2782_v42 = vrot.slane %v2774_v19, %v2721_v47  ;;  %v2796_v53 = vrot.slane %v2774_v19, %v2730_v50  ;;  %v2823_v62 = vrot.slane %v2774_v19, %v2799_v54 }
 0x21a   :  { %3565 = vst [vmem:[#allocation6_spill] sm:$0xff] %v2778_v40  ;;  %v2784_v43 = vpop.f32.mrb[3].mxu0  ;;  %v2158_v45 = vpop.f32.mrb[3].mxu1  ;;  %v2849_v6 = vrot.slane %v2774_v19, %v2826_v63  ;;  %3567 = vst [vmem:[#allocation8_spill] sm:$0xff] %v2860_v9  ;;  %v2876_v14 = vrot.slane %v2774_v19, %v2724_v48 }
 0x21b   :  { %v2786_v46 = vadd.f32 %v2158_v45, %v2157_v41  ;;  %v608_v49 = vmul.f32 %v2768_v13, %v2782_v42  ;;  %v2792_v52 = vrot.slane %v2776_v39, %v2721_v47  ;;  %v2812_v59 = vrot.slane %v2776_v39, %v2730_v50  ;;  %v1184_v18 = vpop.permute.xlu1 %1183 }
 0x21c   :  { %v724_v61 = vmul.f32 %v2766_v12, %v2796_v53  ;;  %v2833_v1 = vrot.slane %v2776_v39, %v2799_v54  ;;  %v840_v30 = vmul.f32 %v2770_v15, %v2823_v62  ;;  %v2856_v8 = vrot.slane %v2776_v39, %v2826_v63 }
 0x21d   :  { %616 = vrot.lane.b32.xlu0 %v608_v49, %s2333_s18  ;;  %v609_v58 = vmul.f32 %v2803_v55, %v2792_v52  ;;  %v725_v0 = vmul.f32 %v2816_v60, %v2812_v59  ;;  %v956_v11 = vmul.f32 %v2805_v56, %v2849_v6  ;;  %v2885_v41 = vrot.slane %v2776_v39, %v2724_v48 }
 0x21e   :  { %v841_v7 = vmul.f32 %v2840_v3, %v2833_v1  ;;  %v957_v21 = vmul.f32 %v2864_v36, %v2856_v8  ;;  %v2889_v45 = vrot.slane %v2778_v40, %v2836_v2  ;;  %v2893_v49 = vmul.f32 %v2869_v35, %v2860_v9 }
 0x21f   :  { %618 = vrot.lane.b32.xlu1 %v609_v58, %s2333_s18  ;;  %v2898_v58 = vsub.s32 6, %v2718_v44  ;;  %v1073_v5 = vmul.f32 %v1069_v57, %v2885_v41  ;;  %v2915_v44 = vrot.slane %v2776_v39, %v2733_v51  ;;  %v2956_v34 = vrot.slane %v2786_v46, %v2721_v47 }
 0x220   :  { %3568 = vst [vmem:[#allocation9_spill] sm:$0xff] %v2889_v45  ;;  %3569 = vst [vmem:[#allocation10_spill] sm:$0xff] %v2893_v49 }
 0x221   :  { %732 = vrot.lane.b32.xlu0 %v724_v61, %s2333_s18  ;;  %v1072_v61 = vmul.f32 %v2842_v4, %v2876_v14  ;;  %v2921_v29 = vrot.slane %v2774_v19, %v2898_v58 }
 0x223   :  { %734 = vrot.lane.b32.xlu1 %v725_v0, %s2333_s18  ;;  %v2905_v0 = vrot.slane %v2774_v19, %v2733_v51 }
 0x225   :  { %848 = vrot.lane.b32.xlu0 %v840_v30, %s2333_s18  ;;  %v2909_v30 = vmul.f32 %v2869_v35, %v2889_v45  ;;  %v2928_v45 = vrot.slane %v2776_v39, %v2898_v58 }
 0x227   :  { %850 = vrot.lane.b32.xlu1 %v841_v7, %s2333_s18  ;;  %3570 = vst [vmem:[#allocation11_spill] sm:$0xff] %v2909_v30  ;;  %v1185_v7 = vsel %vm560_vm1, %v2878_v16, %v1184_v18 }
 0x228   :  { %v1189_v10 = vmul.f32 %v1185_v7, %v2915_v44 }
 0x229   :  { %964 = vrot.lane.b32.xlu0 %v956_v11, %s2333_s18  ;;  %v1298_v11 = vpop.permute.xlu0 %1297 }
 0x22a   :  { %v1304_v9 = vmul.f32 %v1298_v11, %v2921_v29 }
 0x22b   :  { %966 = vrot.lane.b32.xlu1 %v957_v21, %s2333_s18  ;;  %v1300_v21 = vpop.permute.xlu1 %1299 }
 0x22c   :  { %v1301_v18 = vsel %vm560_vm1, %v1298_v11, %v1300_v21 }
 0x22d   :  { %1080 = vrot.lane.b32.xlu0 %v1072_v61, %s2333_s18  ;;  %v1188_v61 = vmul.f32 %v2878_v16, %v2905_v0  ;;  %v1414_v30 = vpop.permute.xlu0 %1413  ;;  %v1305_v49 = vmul.f32 %v1301_v18, %v2928_v45 }
 0x22f   :  { %1082 = vrot.lane.b32.xlu1 %v1073_v5, %s2333_s18  ;;  %v2937_v5 = vrot.slane %v2774_v19, %v2836_v2  ;;  %v1416_v40 = vpop.permute.xlu1 %1415  ;;  %v2950_v19 = vrot.slane %v2784_v43, %v2721_v47 }
 0x230   :  { %v1417_v21 = vsel %vm560_vm1, %v1414_v30, %v1416_v40  ;;  %v2963_v40 = vrot.slane %v2784_v43, %v2730_v50 }
 0x231   :  { %1196 = vrot.lane.b32.xlu0 %v1188_v61, %s2333_s18  ;;  %3571 = vst [vmem:[#allocation12_spill] sm:$0xff] %v2937_v5  ;;  %v2943_v61 = vrot.slane %v2776_v39, %v2836_v2  ;;  %v610_v39 = vmul.f32 %v2768_v13, %v2950_v19  ;;  %v2977_v13 = vrot.slane %v2784_v43, %v2799_v54  ;;  %v557_v38 = vpop.permute.xlu0 %556 }
 0x233   :  { %1198 = vrot.lane.b32.xlu1 %v1189_v10, %s2333_s18  ;;  %3572 = vst [vmem:[#allocation13_spill] sm:$0xff] %v2943_v61  ;;  %v1420_v10 = vmul.f32 %v1414_v30, %v2937_v5  ;;  %v3044_v5 = vrot.slane %v2784_v43, %v2836_v2 }
 0x235   :  { %1312 = vrot.lane.b32.xlu0 %v1304_v9, %s2333_s18  ;;  %v1421_v9 = vmul.f32 %v1417_v21, %v2943_v61  ;;  %v3029_v61 = vrot.slane %v2784_v43, %v2898_v58 }
 0x237   :  { %1314 = vrot.lane.b32.xlu1 %v1305_v49, %s2333_s18  ;;  %v611_v49 = vmul.f32 %v2803_v55, %v2956_v34  ;;  %v2984_v55 = vrot.slane %v2786_v46, %v2799_v54 }
 0x239   :  { %1428 = vrot.lane.b32.xlu0 %v1420_v10, %s2333_s18  ;;  %v2970_v10 = vrot.slane %v2786_v46, %v2730_v50 }
 0x23b   :  { %1430 = vrot.lane.b32.xlu1 %v1421_v9, %s2333_s18  ;;  %v726_v9 = vmul.f32 %v2766_v12, %v2963_v40  ;;  %v2991_v12 = vrot.slane %v2784_v43, %v2826_v63 }
 0x23d   :  { %620 = vrot.lane.b32.xlu0 %v610_v39, %s2333_s18  ;;  %v727_v39 = vmul.f32 %v2816_v60, %v2970_v10  ;;  %v2998_v60 = vrot.slane %v2786_v46, %v2826_v63 }
 0x23f   :  { %622 = vrot.lane.b32.xlu1 %v611_v49, %s2333_s18  ;;  %v842_v49 = vmul.f32 %v2770_v15, %v2977_v13  ;;  %v3005_v15 = vrot.slane %v2784_v43, %v2724_v48 }
 0x241   :  { %736 = vrot.lane.b32.xlu0 %v726_v9, %s2333_s18  ;;  %v843_v9 = vmul.f32 %v2840_v3, %v2984_v55  ;;  %v3012_v3 = vrot.slane %v2786_v46, %v2724_v48 }
 0x243   :  { %738 = vrot.lane.b32.xlu1 %v727_v39, %s2333_s18  ;;  %v958_v39 = vmul.f32 %v2805_v56, %v2991_v12  ;;  %v3019_v56 = vrot.slane %v2784_v43, %v2733_v51 }
 0x245   :  { %852 = vrot.lane.b32.xlu0 %v842_v49, %s2333_s18  ;;  %v959_v49 = vmul.f32 %v2864_v36, %v2998_v60  ;;  %v3025_v36 = vrot.slane %v2786_v46, %v2733_v51 }
 0x247   :  { %854 = vrot.lane.b32.xlu1 %v843_v9, %s2333_s18  ;;  %v1074_v9 = vmul.f32 %v2842_v4, %v3005_v15  ;;  %v1190_v4 = vmul.f32 %v2878_v16, %v3019_v56 }
 0x249   :  { %968 = vrot.lane.b32.xlu0 %v958_v39, %s2333_s18  ;;  %v1075_v39 = vmul.f32 %v1069_v57, %v3012_v3  ;;  %v1191_v57 = vmul.f32 %v1185_v7, %v3025_v36  ;;  %v1422_v7 = vmul.f32 %v1414_v30, %v3044_v5 }
 0x24b   :  { %970 = vrot.lane.b32.xlu1 %v959_v49, %s2333_s18  ;;  %v3036_v49 = vrot.slane %v2786_v46, %v2898_v58 }
 0x24d   :  { %1084 = vrot.lane.b32.xlu0 %v1074_v9, %s2333_s18  ;;  %v1306_v9 = vmul.f32 %v1298_v11, %v3029_v61  ;;  %v1307_v16 = vmul.f32 %v1301_v18, %v3036_v49  ;;  %v566_v18 = vmul.f32 %v557_v38, %v2950_v19 }
 0x24f   :  { %1086 = vrot.lane.b32.xlu1 %v1075_v39, %s2333_s18  ;;  %v3050_v39 = vrot.slane %v2786_v46, %v2836_v2  ;;  %v3063_v46 = vld [vmem:[%s3541_s4 + $0x78] sm:$0xff] }
 0x251   :  { %1200 = vrot.lane.b32.xlu0 %v1190_v4, %s2333_s18  ;;  %v1423_v11 = vmul.f32 %v1417_v21, %v3050_v39  ;;  %v559_v4 = vpop.permute.xlu1 %558 }
 0x252   :  { %v561_v43 = vsel %vm560_vm1, %v557_v38, %v559_v4 }
 0x253   :  { %1202 = vrot.lane.b32.xlu1 %v1191_v57, %s2333_s18  ;;  %v675_v57 = vpop.permute.xlu0 %674  ;;  %v565_v30 = vmul.f32 %v561_v43, %v2792_v52 }
 0x255   :  { %1316 = vrot.lane.b32.xlu0 %v1306_v9, %s2333_s18  ;;  %v677_v9 = vpop.permute.xlu1 %676 }
 0x257   :  { %1318 = vrot.lane.b32.xlu1 %v1307_v16, %s2333_s18  ;;  %v791_v21 = vpop.permute.xlu0 %790  ;;  %v678_v16 = vsel %vm560_vm1, %v675_v57, %v677_v9 }
 0x258   :  { %v682_v52 = vmul.f32 %v678_v16, %v2812_v59  ;;  %v799_v4 = vmul.f32 %v791_v21, %v2977_v13 }
 0x259   :  { %1432 = vrot.lane.b32.xlu0 %v1422_v7, %s2333_s18  ;;  %v683_v7 = vmul.f32 %v675_v57, %v2963_v40 }
 0x25b   :  { %1434 = vrot.lane.b32.xlu1 %v1423_v11, %s2333_s18  ;;  %v907_v11 = vpop.permute.xlu0 %906 }
 0x25c   :  { %v915_v9 = vmul.f32 %v907_v11, %v2991_v12 }
 0x25d   :  { %1370 = vrot.lane.b32.xlu0 %v2869_v35, %s2332_s22  ;;  %v564_v35 = vmul.f32 %v557_v38, %v2782_v42  ;;  %v681_v38 = vmul.f32 %v675_v57, %v2796_v53  ;;  %v797_v57 = vmul.f32 %v791_v21, %v2823_v62 }
 0x25f   :  { %1372 = vrot.lane.b32.xlu1 %v3063_v46, %s2332_s22 }
 0x261   :  { %574 = vrot.lane.b32.xlu0 %v565_v30, %s2333_s18  ;;  %v793_v30 = vpop.permute.xlu1 %792 }
 0x263   :  { %576 = vrot.lane.b32.xlu1 %v566_v18, %s2333_s18  ;;  %v794_v18 = vsel %vm560_vm1, %v791_v21, %v793_v30  ;;  %v913_v21 = vmul.f32 %v907_v11, %v2849_v6 }
 0x264   :  { %v798_v59 = vmul.f32 %v794_v18, %v2833_v1 }
 0x265   :  { %572 = vrot.lane.b32.xlu0 %v564_v35, %s2333_s18  ;;  %v1023_v35 = vpop.permute.xlu0 %1022 }
 0x267   :  { %693 = vrot.lane.b32.xlu1 %v683_v7, %s2333_s18  ;;  %v1031_v7 = vmul.f32 %v1023_v35, %v3005_v15 }
 0x269   :  { %691 = vrot.lane.b32.xlu0 %v682_v52, %s2333_s18  ;;  %v909_v52 = vpop.permute.xlu1 %908  ;;  %v1139_v30 = vpop.permute.xlu0 %1138 }
 0x26b   :  { %809 = vrot.lane.b32.xlu1 %v799_v4, %s2333_s18  ;;  %v910_v4 = vsel %vm560_vm1, %v907_v11, %v909_v52  ;;  %v684_v52 = vmul.f32 %v678_v16, %v2970_v10  ;;  %v2251_v10 = vld [vmem:[%s3539_s5] ss:$8 sps:$4 sm:$0xff]   ;;  %v2256_v16 = vld [vmem:[%s3539_s5 + $0x14] ss:$8 sps:$4 sm:$0xff]  }
 0x26c   :  { %v914_v1 = vmul.f32 %v910_v4, %v2856_v8  ;;  %v800_v8 = vmul.f32 %v794_v18, %v2984_v55 }
 0x26d   :  { %689 = vrot.lane.b32.xlu0 %v681_v38, %s2333_s18  ;;  %v1147_v38 = vmul.f32 %v1139_v30, %v3019_v56  ;;  %v3122_v18 = vpop.permute.xlu0 %1254 }
 0x26f   :  { %925 = vrot.lane.b32.xlu1 %v915_v9, %s2333_s18  ;;  %v567_v9 = vmul.f32 %v561_v43, %v2956_v34  ;;  %v1029_v43 = vmul.f32 %v1023_v35, %v2876_v14 }
 0x271   :  { %807 = vrot.lane.b32.xlu0 %v798_v59, %s2333_s18  ;;  %v1025_v59 = vpop.permute.xlu1 %1024 }
 0x273   :  { %1041 = vrot.lane.b32.xlu1 %v1031_v7, %s2333_s18  ;;  %v1026_v7 = vsel %vm560_vm1, %v1023_v35, %v1025_v59  ;;  %v3140_v59 = vrot.slane %v2772_v17, %v2721_v47 }
 0x274   :  { %v1032_v35 = vmul.f32 %v1026_v7, %v3012_v3 }
 0x275   :  { %805 = vrot.lane.b32.xlu0 %v797_v57, %s2333_s18  ;;  %v1030_v57 = vmul.f32 %v1026_v7, %v2885_v41  ;;  %v1141_v34 = vpop.permute.xlu1 %1140  ;;  %v2253_v41 = vld [vmem:[%s3539_s5 + $0x4] ss:$8 sps:$4 sm:$0xff]  }
 0x276   :  { %v1142_v11 = vsel %vm560_vm1, %v1139_v30, %v1141_v34  ;;  %1689 = vmatprep.subr.bf16.mxu1 %v2253_v41  ;;  %v591_v34 = vmul.f32 %v3140_v59, %v2618_v20 }
 0x277   :  { %1157 = vrot.lane.b32.xlu1 %v1147_v38, %s2333_s18  ;;  %v916_v38 = vmul.f32 %v910_v4, %v2998_v60  ;;  %v1146_v55 = vmul.f32 %v1142_v11, %v2915_v44  ;;  %1690 = vmatpush1.bf16.msra.mxu1 %v2251_v10  ;;  %v2254_v4 = vld [vmem:[%s3539_s5 + $0x10] ss:$8 sps:$4 sm:$0xff]   ;;  %v2259_v44 = vld [vmem:[%s3539_s5 + $0x24] ss:$8 sps:$4 sm:$0xff]   ;;  %v1148_v3 = vmul.f32 %v1142_v11, %v3025_v36 }
 0x278   :  { %1691 = vmatprep.subr.bf16.mxu1 %v2256_v16  ;;  %v3152_v36 = vrot.slane %v2772_v17, %v2730_v50  ;;  %v708_v10 = vmul.f32 %v2651_v25, %v2796_v53  ;;  %v3171_v16 = vrot.slane %v2772_v17, %v2799_v54 }
 0x279   :  { %923 = vrot.lane.b32.xlu0 %v914_v1, %s2333_s18  ;;  %v1257_v60 = vpop.permute.xlu1 %1256  ;;  %v1145_v1 = vmul.f32 %v1139_v30, %v2905_v0  ;;  %v2262_v30 = vld [vmem:[%s3539_s5 + $0x34] ss:$8 sps:$4 sm:$0xff]  }
 0x27b   :  { %578 = vrot.lane.b32.xlu1 %v567_v9, %s2333_s18  ;;  %v1258_v9 = vsel %vm560_vm1, %v3122_v18, %v1257_v60  ;;  %1692 = vmatpush1.bf16.msra.mxu1 %v2254_v4 }
 0x27c   :  { %1693 = vmatprep.subr.bf16.mxu1 %v2259_v44  ;;  %v1262_v7 = vmul.f32 %v1258_v9, %v2928_v45  ;;  %v2260_v45 = vld [vmem:[%s3539_s5 + $0x30] ss:$8 sps:$4 sm:$0xff]  }
 0x27d   :  { %921 = vrot.lane.b32.xlu0 %v913_v21, %s2333_s18  ;;  %v2257_v21 = vld [vmem:[%s3539_s5 + $0x20] ss:$8 sps:$4 sm:$0xff]  }
 0x27f   :  { %695 = vrot.lane.b32.xlu1 %v684_v52, %s2333_s18  ;;  %1694 = vmatpush1.bf16.msra.mxu1 %v2257_v21 }
 0x280   :  { %1695 = vmatprep.subr.bf16.mxu1 %v2262_v30  ;;  %v823_v30 = vmul.f32 %v2642_v24, %v3171_v16 }
 0x281   :  { %1039 = vrot.lane.b32.xlu0 %v1030_v57, %s2333_s18  ;;  %v592_v57 = vmul.f32 %v2782_v42, %v2637_v23 }
 0x283   :  { %811 = vrot.lane.b32.xlu1 %v800_v8, %s2333_s18  ;;  %v1264_v8 = vmul.f32 %v1258_v9, %v3036_v49  ;;  %1696 = vmatpush1.bf16.msra.mxu1 %v2260_v45  ;;  %v824_v9 = vmul.f32 %v2665_v27, %v2823_v62  ;;  %v940_v45 = vmul.f32 %v2679_v31, %v2849_v6 }
 0x285   :  { %1037 = vrot.lane.b32.xlu0 %v1029_v43, %s2333_s18 }
 0x287   :  { %927 = vrot.lane.b32.xlu1 %v916_v38, %s2333_s18 }
 0x289   :  { %1155 = vrot.lane.b32.xlu0 %v1146_v55, %s2333_s18  ;;  %v707_v55 = vmul.f32 %v2629_v22, %v3152_v36 }
 0x28b   :  { %1043 = vrot.lane.b32.xlu1 %v1032_v35, %s2333_s18 }
 0x28d   :  { %1153 = vrot.lane.b32.xlu0 %v1145_v1, %s2333_s18 }
 0x28f   :  { %1159 = vrot.lane.b32.xlu1 %v1148_v3, %s2333_s18  ;;  %v617_v52 = vpop.permute.xlu0 %616 }
 0x291   :  { %v619_v43 = vpop.permute.xlu1 %618  ;;  %1271 = vrot.lane.b32.xlu0 %v1262_v7, %s2333_s18  ;;  %v3180_v7 = vrot.slane %v2772_v17, %v2826_v63 }
 0x292   :  { %v624_v11 = vsel %vm580_vm2, %v617_v52, %v619_v43  ;;  %v631_v38 = vadd.f32 %v619_v43, %v592_v57 }
 0x293   :  { %v630_v41 = vadd.f32 %v624_v11, %v591_v34  ;;  %1275 = vrot.lane.b32.xlu1 %v1264_v8, %s2333_s18  ;;  %v733_v49 = vpop.permute.xlu0 %732 }
 0x294   :  { %v712_v60 = vadd.f32 %v708_v10, %v631_v38  ;;  %v939_v10 = vmul.f32 %v2656_v26, %v3180_v7 }
 0x295   :  { %v735_v35 = vpop.permute.xlu1 %734  ;;  %v711_v4 = vadd.f32 %v707_v55, %v630_v41  ;;  %v3189_v41 = vrot.slane %v2772_v17, %v2724_v48 }
 0x296   :  { %v740_v44 = vsel %vm580_vm2, %v733_v49, %v735_v35  ;;  %v747_v1 = vadd.f32 %v735_v35, %v712_v60 }
 0x297   :  { %v746_v3 = vadd.f32 %v740_v44, %v711_v4  ;;  %v849_v21 = vpop.permute.xlu0 %848  ;;  %v1056_v44 = vmul.f32 %v2693_v33, %v2876_v14 }
 0x298   :  { %v828_v52 = vadd.f32 %v824_v9, %v747_v1 }
 0x299   :  { %v851_v57 = vpop.permute.xlu1 %850  ;;  %v827_v8 = vadd.f32 %v823_v30, %v746_v3  ;;  %v1055_v3 = vmul.f32 %v2670_v28, %v3189_v41 }
 0x29a   :  { %v856_v34 = vsel %vm580_vm2, %v849_v21, %v851_v57  ;;  %v863_v43 = vadd.f32 %v851_v57, %v828_v52  ;;  %v3198_v21 = vrot.slane %v2772_v17, %v2733_v51 }
 0x29b   :  { %v862_v11 = vadd.f32 %v856_v34, %v827_v8  ;;  %v965_v38 = vpop.permute.xlu0 %964 }
 0x29c   :  { %v944_v49 = vadd.f32 %v940_v45, %v863_v43  ;;  %v1172_v43 = vmul.f32 %v2707_v37, %v2905_v0 }
 0x29d   :  { %v967_v55 = vpop.permute.xlu1 %966  ;;  %v943_v60 = vadd.f32 %v939_v10, %v862_v11  ;;  %v3207_v10 = vrot.slane %v2772_v17, %v2898_v58  ;;  %v2263_v17 = vld [vmem:[%s3539_s5 + $0x40] ss:$8 sps:$4 sm:$0xff]  }
 0x29e   :  { %v972_v35 = vsel %vm580_vm2, %v965_v38, %v967_v55  ;;  %v979_v4 = vadd.f32 %v967_v55, %v944_v49  ;;  %v1171_v38 = vmul.f32 %v2684_v32, %v3198_v21 }
 0x29f   :  { %v978_v1 = vadd.f32 %v972_v35, %v943_v60  ;;  %v1081_v9 = vpop.permute.xlu0 %1080 }
 0x2a0   :  { %v1060_v30 = vadd.f32 %v1056_v44, %v979_v4  ;;  %v3573_v44 = vld [vmem:[#allocation3_spill] sm:$0xff] }
 0x2a1   :  { %v1083_v52 = vpop.permute.xlu1 %1082  ;;  %v1059_v57 = vadd.f32 %v1055_v3, %v978_v1  ;;  %v1288_v1 = vmul.f32 %v3573_v44, %v2921_v29 }
 0x2a2   :  { %v1088_v8 = vsel %vm580_vm2, %v1081_v9, %v1083_v52  ;;  %v1095_v34 = vadd.f32 %v1083_v52, %v1060_v30  ;;  %v3574_v30 = vld [vmem:[#allocation2_spill] sm:$0xff] }
 0x2a3   :  { %v1094_v45 = vadd.f32 %v1088_v8, %v1059_v57  ;;  %v1197_v11 = vpop.permute.xlu0 %1196  ;;  %v1287_v52 = vmul.f32 %v3574_v30, %v3207_v10  ;;  %v2265_v8 = vld [vmem:[%s3539_s5 + $0x44] ss:$8 sps:$4 sm:$0xff]  }
 0x2a4   :  { %v1176_v49 = vadd.f32 %v1172_v43, %v1095_v34  ;;  %1697 = vmatprep.subr.bf16.mxu1 %v2265_v8  ;;  %v3577_v8 = vld [vmem:[#allocation6_spill] sm:$0xff] }
 0x2a5   :  { %v1199_v55 = vpop.permute.xlu1 %1198  ;;  %v1175_v60 = vadd.f32 %v1171_v38, %v1094_v45  ;;  %v3575_v45 = vld [vmem:[#allocation12_spill] sm:$0xff]  ;;  %1698 = vmatpush1.bf16.msra.mxu1 %v2263_v17 }
 0x2a6   :  { %v1204_v35 = vsel %vm580_vm2, %v1197_v11, %v1199_v55  ;;  %v1211_v4 = vadd.f32 %v1199_v55, %v1176_v49  ;;  %v1404_v11 = vmul.f32 %v3063_v46, %v3575_v45 }
 0x2a7   :  { %v1210_v9 = vadd.f32 %v1204_v35, %v1175_v60  ;;  %v1313_v3 = vpop.permute.xlu0 %1312  ;;  %v2266_v35 = vld [vmem:[%s3539_s5 + $0x50] ss:$8 sps:$4 sm:$0xff]  }
 0x2a8   :  { %v1292_v57 = vadd.f32 %v1288_v1, %v1211_v4  ;;  %v2268_v4 = vld [vmem:[%s3539_s5 + $0x54] ss:$8 sps:$4 sm:$0xff]  }
 0x2a9   :  { %v1315_v34 = vpop.permute.xlu1 %1314  ;;  %v1291_v43 = vadd.f32 %v1287_v52, %v1210_v9  ;;  %v2271_v9 = vld [vmem:[%s3539_s5 + $0x64] ss:$8 sps:$4 sm:$0xff]   ;;  %1699 = vmatprep.subr.bf16.mxu1 %v2268_v4 }
 0x2aa   :  { %v1320_v38 = vsel %vm580_vm2, %v1313_v3, %v1315_v34  ;;  %v1327_v49 = vadd.f32 %v1315_v34, %v1292_v57  ;;  %v3576_v3 = vld [vmem:[#allocation10_spill] sm:$0xff]  ;;  %v3235_v34 = vrot.slane %v3577_v8, %v2721_v47  ;;  %1700 = vmatpush1.bf16.msra.mxu1 %v2266_v35  ;;  %v2274_v47 = vld [vmem:[%s3539_s5 + $0x74] ss:$8 sps:$4 sm:$0xff]  }
 0x2ab   :  { %v1326_v55 = vadd.f32 %v1320_v38, %v1291_v43  ;;  %v1429_v60 = vpop.permute.xlu0 %1428  ;;  %1701 = vmatprep.subr.bf16.mxu1 %v2271_v9 }
 0x2ac   :  { %v1408_v1 = vadd.f32 %v1404_v11, %v1327_v49  ;;  %v3240_v11 = vrot.slane %v3577_v8, %v2730_v50  ;;  %v2269_v49 = vld [vmem:[%s3539_s5 + $0x60] ss:$8 sps:$4 sm:$0xff]   ;;  %v593_v4 = vmul.f32 %v3235_v34, %v2618_v20  ;;  %v2272_v20 = vld [vmem:[%s3539_s5 + $0x70] ss:$8 sps:$4 sm:$0xff]  }
 0x2ad   :  { %v1431_v52 = vpop.permute.xlu1 %1430  ;;  %v1407_v57 = vadd.f32 %v3576_v3, %v1326_v55  ;;  %v594_v55 = vmul.f32 %v2950_v19, %v2637_v23 }
 0x2ae   :  { %v1436_v17 = vsel %vm580_vm2, %v1429_v60, %v1431_v52  ;;  %v1443_v43 = vadd.f32 %v1431_v52, %v1408_v1  ;;  %v710_v52 = vmul.f32 %v2651_v25, %v2963_v40  ;;  %v709_v9 = vmul.f32 %v2629_v22, %v3240_v11  ;;  %1702 = vmatpush1.bf16.msra.mxu1 %v2269_v49  ;;  %v2277_v25 = vld [vmem:[%s3539_s5 + $0x84] ss:$8 sps:$4 sm:$0xff]  }
 0x2af   :  { %v1442_v38 = vadd.f32 %v1436_v17, %v1407_v57  ;;  %v621_v2 = vpop.permute.xlu0 %620  ;;  %v3260_v57 = vrot.slane %v3577_v8, %v2799_v54  ;;  %1703 = vmatprep.subr.bf16.mxu1 %v2274_v47  ;;  %v1261_v17 = vmul.f32 %v3122_v18, %v2921_v29  ;;  %v826_v49 = vmul.f32 %v2665_v27, %v2977_v13  ;;  %v2280_v27 = vld [vmem:[%s3539_s5 + $0x94] ss:$8 sps:$4 sm:$0xff]  }
 0x2b1   :  { %v2168_v60 = vpack.i.bf16 %v1443_v43, %v1442_v38  ;;  %v623_v1 = vpop.permute.xlu1 %622  ;;  %v825_v47 = vmul.f32 %v2642_v24, %v3260_v57 }
 0x2b2   :  { %v625_v50 = vsel %vm580_vm2, %v621_v2, %v623_v1  ;;  %v633_v35 = vadd.f32 %v623_v1, %v594_v55  ;;  %v3278_v1 = vrot.slane %v3577_v8, %v2826_v63  ;;  %1704 = vmatpush1.bf16.msra.mxu1 %v2272_v20 }
 0x2b3   :  { %v632_v3 = vadd.f32 %v625_v50, %v593_v4  ;;  %2169 = vrot.lane.b32.xlu0 %v2168_v60, %s2332_s22  ;;  %v737_v23 = vpop.permute.xlu0 %736  ;;  %v2275_v50 = vld [vmem:[%s3539_s5 + $0x80] ss:$8 sps:$4 sm:$0xff]   ;;  %1705 = vmatprep.subr.bf16.mxu1 %v2277_v25  ;;  %v3293_v25 = vrot.slane %v3577_v8, %v2724_v48  ;;  %v1058_v48 = vmul.f32 %v2693_v33, %v3005_v15  ;;  %v2286_v33 = vld [vmem:[%s3539_s5 + $0xb4] ss:$8 sps:$4 sm:$0xff]  }
 0x2b4   :  { %v714_v2 = vadd.f32 %v710_v52, %v633_v35 }
 0x2b5   :  { %v739_v43 = vpop.permute.xlu1 %738  ;;  %v713_v22 = vadd.f32 %v709_v9, %v632_v3  ;;  %v942_v9 = vmul.f32 %v2679_v31, %v2991_v12  ;;  %v2283_v31 = vld [vmem:[%s3539_s5 + $0xa4] ss:$8 sps:$4 sm:$0xff]  }
 0x2b6   :  { %v741_v38 = vsel %vm580_vm2, %v737_v23, %v739_v43  ;;  %v749_v55 = vadd.f32 %v739_v43, %v714_v2  ;;  %1706 = vmatpush1.bf16.msra.mxu1 %v2275_v50  ;;  %v2278_v43 = vld [vmem:[%s3539_s5 + $0x90] ss:$8 sps:$4 sm:$0xff]   ;;  %v3308_v50 = vrot.slane %v3577_v8, %v2733_v51  ;;  %v1174_v51 = vmul.f32 %v2707_v37, %v3019_v56 }
 0x2b7   :  { %v748_v60 = vadd.f32 %v741_v38, %v713_v22  ;;  %1269 = vrot.lane.b32.xlu0 %v1261_v17, %s2333_s18  ;;  %v853_v4 = vpop.permute.xlu0 %852  ;;  %v941_v17 = vmul.f32 %v2656_v26, %v3278_v1  ;;  %1707 = vmatprep.subr.bf16.mxu1 %v2280_v27 }
 0x2b8   :  { %v830_v35 = vadd.f32 %v826_v49, %v749_v55 }
 0x2b9   :  { %v855_v52 = vpop.permute.xlu1 %854  ;;  %v829_v3 = vadd.f32 %v825_v47, %v748_v60  ;;  %v1057_v47 = vmul.f32 %v2670_v28, %v3293_v25 }
 0x2ba   :  { %v857_v23 = vsel %vm580_vm2, %v853_v4, %v855_v52  ;;  %v865_v24 = vadd.f32 %v855_v52, %v830_v35  ;;  %1708 = vmatpush1.bf16.msra.mxu1 %v2278_v43  ;;  %v2281_v35 = vld [vmem:[%s3539_s5 + $0xa0] ss:$8 sps:$4 sm:$0xff]  }
 0x2bb   :  { %v864_v2 = vadd.f32 %v857_v23, %v829_v3  ;;  %v969_v20 = vpop.permute.xlu0 %968  ;;  %1709 = vmatprep.subr.bf16.mxu1 %v2283_v31 }
 0x2bc   :  { %v946_v22 = vadd.f32 %v942_v9, %v865_v24 }
 0x2bd   :  { %v971_v38 = vpop.permute.xlu1 %970  ;;  %v945_v55 = vadd.f32 %v941_v17, %v864_v2  ;;  %v1173_v2 = vmul.f32 %v2684_v32, %v3308_v50  ;;  %v2284_v17 = vld [vmem:[%s3539_s5 + $0xb0] ss:$8 sps:$4 sm:$0xff]  }
 0x2be   :  { %v973_v49 = vsel %vm580_vm2, %v969_v20, %v971_v38  ;;  %v981_v26 = vadd.f32 %v971_v38, %v946_v22  ;;  %v3323_v20 = vrot.slane %v3577_v8, %v2898_v58  ;;  %1710 = vmatpush1.bf16.msra.mxu1 %v2281_v35 }
 0x2bf   :  { %v980_v60 = vadd.f32 %v973_v49, %v945_v55  ;;  %v1085_v4 = vpop.permute.xlu0 %1084  ;;  %1711 = vmatprep.subr.bf16.mxu1 %v2286_v33  ;;  %v1290_v55 = vmul.f32 %v3573_v44, %v3029_v61  ;;  %v1406_v44 = vmul.f32 %v3063_v46, %v3044_v5 }
 0x2c0   :  { %v1062_v27 = vadd.f32 %v1058_v48, %v981_v26  ;;  %v1289_v8 = vmul.f32 %v3574_v30, %v3323_v20 }
 0x2c1   :  { %v1087_v52 = vpop.permute.xlu1 %1086  ;;  %v1061_v3 = vadd.f32 %v1057_v47, %v980_v60  ;;  %v2289_v47 = vld [vmem:[%s3539_s5 + $0xc4] ss:$8 sps:$4 sm:$0xff]  }
 0x2c2   :  { %v1089_v23 = vsel %vm580_vm2, %v1085_v4, %v1087_v52  ;;  %v1097_v28 = vadd.f32 %v1087_v52, %v1062_v27  ;;  %1712 = vmatpush1.bf16.msra.mxu1 %v2284_v17  ;;  %v2287_v4 = vld [vmem:[%s3539_s5 + $0xc0] ss:$8 sps:$4 sm:$0xff]   ;;  %v2292_v52 = vld [vmem:[%s3539_s5 + $0xd4] ss:$8 sps:$4 sm:$0xff]   ;;  %v2295_v17 = vld [vmem:[%s3539_s5 + $0xe4] ss:$8 sps:$4 sm:$0xff]  }
 0x2c3   :  { %v1096_v24 = vadd.f32 %v1089_v23, %v1061_v3  ;;  %v1201_v9 = vpop.permute.xlu0 %1200  ;;  %1713 = vmatprep.subr.bf16.mxu1 %v2289_v47  ;;  %v2334_v23 = vmov 0  }
 0x2c4   :  { %v1178_v43 = vadd.f32 %v1174_v51, %v1097_v28  ;;  %1764 = vmatprep.mubr.bf16.mxu0 %v2334_v23  ;;  %v2290_v28 = vld [vmem:[%s3539_s5 + $0xd0] ss:$8 sps:$4 sm:$0xff]   ;;  %v3578_v51 = vld [vmem:[#allocation11_spill] sm:$0xff]  ;;  %2178 = vset.pattern.permute.xlu0 %v2334_v23 }
 0x2c5   :  { %v1203_v22 = vpop.permute.xlu1 %1202  ;;  %v1177_v31 = vadd.f32 %v1173_v2, %v1096_v24 }
 0x2c6   :  { %v1205_v37 = vsel %vm580_vm2, %v1201_v9, %v1203_v22  ;;  %v1213_v38 = vadd.f32 %v1203_v22, %v1178_v43  ;;  %1714 = vmatpush1.bf16.msra.mxu1 %v2287_v4  ;;  %v3371_v4 = vld [vmem:[%s3540_s3 + $0x18] sm:$0xff] }
 0x2c7   :  { %v1212_v32 = vadd.f32 %v1205_v37, %v1177_v31  ;;  %v1317_v49 = vpop.permute.xlu0 %1316  ;;  %1715 = vmatprep.subr.bf16.mxu1 %v2292_v52  ;;  %v2293_v31 = vld [vmem:[%s3539_s5 + $0xe0] ss:$8 sps:$4 sm:$0xff]   ;;  %v657_v47 = vmul.f32 %v3371_v4, %v2796_v53 }
 0x2c8   :  { %v1294_v26 = vadd.f32 %v1290_v55, %v1213_v38  ;;  %v2317_v53 = vld [vmem:[%s3540_s3] sm:$0xff] }
 0x2c9   :  { %v1319_v48 = vpop.permute.xlu1 %1318  ;;  %v1293_v60 = vadd.f32 %v1289_v8, %v1212_v32  ;;  %v3362_v32 = vld [vmem:[%s3540_s3 + $0x8] sm:$0xff]  ;;  %v3579_v8 = vld [vmem:[#allocation13_spill] sm:$0xff] }
 0x2ca   :  { %v1321_v35 = vsel %vm580_vm2, %v1317_v49, %v1319_v48  ;;  %v1329_v27 = vadd.f32 %v1319_v48, %v1294_v26  ;;  %1716 = vmatpush1.bf16.msra.mxu1 %v2290_v28  ;;  %v539_v49 = vmul.f32 %v3362_v32, %v2782_v42  ;;  %v2296_v42 = vld [vmem:[%s3539_s5 + $0xf0] ss:$8 sps:$4 sm:$0xff]  }
 0x2cb   :  { %v1328_v33 = vadd.f32 %v1321_v35, %v1293_v60  ;;  %v1433_v30 = vpop.permute.xlu0 %1432  ;;  %1717 = vmatprep.subr.bf16.mxu1 %v2295_v17 }
 0x2cc   :  { %v1410_v3 = vadd.f32 %v1406_v44, %v1329_v27  ;;  %v1263_v44 = vmul.f32 %v3122_v18, %v3029_v61  ;;  %v2298_v27 = vld [vmem:[%s3539_s5 + $0xf4] ss:$8 sps:$4 sm:$0xff]   ;;  %v538_v18 = vmul.f32 %v2317_v53, %v3140_v59 }
 0x2cd   :  { %v1435_v46 = vpop.permute.xlu1 %1434  ;;  %v1409_v24 = vadd.f32 %v3578_v51, %v1328_v33 }
 0x2ce   :  { %v1437_v9 = vsel %vm580_vm2, %v1433_v30, %v1435_v46  ;;  %v1445_v2 = vadd.f32 %v1435_v46, %v1410_v3  ;;  %1718 = vmatpush1.bf16.msra.mxu1 %v2293_v31  ;;  %v2335_v31 = vmov 1  }
 0x2cf   :  { %v1444_v43 = vadd.f32 %v1437_v9, %v1409_v24  ;;  %v1371_v22 = vpop.permute.xlu0 %1370  ;;  %1719 = vmatprep.subr.bf16.mxu1 %v2298_v27  ;;  %v2318_v24 = vld [vmem:[%s3540_s3 + $0x10] sm:$0xff]  ;;  %2179 = vset.pattern.permute.xlu1 %v2335_v31 }
 0x2d0   :  { %v1377_v30 = vmul.f32 %v1371_v22, %v3575_v45  ;;  %v656_v9 = vmul.f32 %v2318_v24, %v3152_v36 }
 0x2d1   :  { %v2173_v37 = vpack.i.bf16 %v1445_v2, %v1444_v43  ;;  %v1373_v38 = vpop.permute.xlu1 %1372 }
 0x2d2   :  { %v1374_v55 = vsel %vm560_vm1, %v1371_v22, %v1373_v38  ;;  %1720 = vmatpush1.bf16.msra.mxu1 %v2296_v42  ;;  %v1379_v38 = vmul.f32 %v1371_v22, %v3044_v5  ;;  %v2321_v42 = vld [vmem:[%s3540_s3 + $0x38] sm:$0xff] }
 0x2d3   :  { %v1378_v26 = vmul.f32 %v1374_v55, %v3579_v8  ;;  %2174 = vrot.lane.b32.xlu1 %v2173_v37, %s2332_s22  ;;  %v575_v48 = vpop.permute.xlu0 %574  ;;  %v1380_v28 = vmul.f32 %v1374_v55, %v3050_v39  ;;  %v2319_v39 = vld [vmem:[%s3540_s3 + $0x28] sm:$0xff]  ;;  %v1775_v37 = vld [vmem:[%s3543_s6] sm:$0xff]  ;;  %v889_v27 = vmul.f32 %v2321_v42, %v2849_v6  ;;  %v541_v6 = vmul.f32 %v3362_v32, %v2950_v19 }
 0x2d4   :  { %v588_v60 = vsub.f32 %v539_v49, %v575_v48  ;;  %v773_v43 = vmul.f32 %v2319_v39, %v2823_v62  ;;  %v2320_v62 = vld [vmem:[%s3540_s3 + $0x20] sm:$0xff]  ;;  %v658_v19 = vmul.f32 %v2318_v24, %v3240_v11 }
 0x2d5   :  { %v3377_v35 = vpop.permute.xlu1 %576  ;;  %1387 = vrot.lane.b32.xlu0 %v1378_v26, %s2333_s18  ;;  %v774_v24 = vmul.f32 %v2320_v62, %v3260_v57 }
 0x2d6   :  { %v661_v33 = vadd.f32 %v657_v47, %v588_v60  ;;  %v772_v60 = vmul.f32 %v2320_v62, %v3171_v16  ;;  %v2322_v16 = vld [vmem:[%s3540_s3 + $0x30] sm:$0xff] }
 0x2d7   :  { %1273 = vrot.lane.b32.xlu1 %v1263_v44, %s2333_s18  ;;  %v573_v52 = vpop.permute.xlu0 %572  ;;  %v890_v57 = vmul.f32 %v2322_v16, %v3278_v1 }
 0x2d8   :  { %v581_v3 = vsel %vm580_vm2, %v573_v52, %v575_v48 }
 0x2d9   :  { %v587_v46 = vsub.f32 %v538_v18, %v581_v3  ;;  %v3394_v51 = vpop.permute.xlu1 %693  ;;  %1385 = vrot.lane.b32.xlu0 %v1377_v30, %s2333_s18 }
 0x2db   :  { %1391 = vrot.lane.b32.xlu1 %v1380_v28, %s2333_s18  ;;  %v692_v59 = vpop.permute.xlu0 %691  ;;  %v660_v2 = vadd.f32 %v656_v9, %v587_v46  ;;  %v888_v46 = vmul.f32 %v2322_v16, %v3180_v7  ;;  %v659_v7 = vmul.f32 %v3371_v4, %v2963_v40 }
 0x2dc   :  { %v704_v17 = vsub.f32 %v661_v33, %v692_v59 }
 0x2dd   :  { %v810_v36 = vpop.permute.xlu1 %809  ;;  %1778 = vperm.xlu0 %2178, %v1775_v37  }
 0x2de   :  { %v777_v55 = vadd.f32 %v773_v43, %v704_v17  ;;  %v2323_v17 = vld [vmem:[%s3540_s3 + $0x48] sm:$0xff] }
 0x2df   :  { %1389 = vrot.lane.b32.xlu1 %v1379_v38, %s2333_s18  ;;  %v690_v49 = vpop.permute.xlu0 %689  ;;  %v1005_v43 = vmul.f32 %v2323_v17, %v2876_v14 }
 0x2e0   :  { %v697_v8 = vsel %vm580_vm2, %v690_v49, %v692_v59 }
 0x2e1   :  { %v703_v26 = vsub.f32 %v660_v2, %v697_v8  ;;  %v3412_v48 = vpop.permute.xlu1 %925  ;;  %2180 = vset.pattern.permute.xlu0 %v2335_v31  ;;  %v540_v31 = vmul.f32 %v2317_v53, %v3235_v34  ;;  %v2324_v34 = vld [vmem:[%s3540_s3 + $0x40] sm:$0xff]  ;;  %v775_v53 = vmul.f32 %v2319_v39, %v2977_v13  ;;  %v891_v13 = vmul.f32 %v2321_v42, %v2991_v12 }
 0x2e2   :  { %v1006_v16 = vmul.f32 %v2324_v34, %v3293_v25 }
 0x2e3   :  { %v808_v47 = vpop.permute.xlu0 %807  ;;  %v776_v22 = vadd.f32 %v772_v60, %v703_v26  ;;  %1890 = vperm.xlu1 %2179, %v1775_v37  }
 0x2e4   :  { %v820_v44 = vsub.f32 %v777_v55, %v808_v47 }
 0x2e5   :  { %v3422_v33 = vpop.permute.xlu1 %1041 }
 0x2e6   :  { %v893_v30 = vadd.f32 %v889_v27, %v820_v44 }
 0x2e7   :  { %v806_v18 = vpop.permute.xlu0 %805 }
 0x2e8   :  { %v813_v52 = vsel %vm580_vm2, %v806_v18, %v808_v47 }
 0x2e9   :  { %v819_v3 = vsub.f32 %v776_v22, %v813_v52  ;;  %v3425_v28 = vpop.permute.xlu1 %1157  ;;  %v2325_v52 = vld [vmem:[%s3540_s3 + $0x58] sm:$0xff] }
 0x2eb   :  { %v924_v9 = vpop.permute.xlu0 %923  ;;  %v892_v59 = vadd.f32 %v888_v46, %v819_v3  ;;  %v1121_v3 = vmul.f32 %v2325_v52, %v2905_v0  ;;  %v2326_v0 = vld [vmem:[%s3540_s3 + $0x50] sm:$0xff] }
 0x2ec   :  { %v936_v2 = vsub.f32 %v893_v30, %v924_v9 }
 0x2ed   :  { %v579_v37 = vpop.permute.xlu1 %578 }
 0x2ee   :  { %v582_v38 = vsel %vm580_vm2, %v3377_v35, %v579_v37  ;;  %v590_v55 = vsub.f32 %v541_v6, %v579_v37  ;;  %v1009_v49 = vadd.f32 %v1005_v43, %v936_v2  ;;  %v1004_v35 = vmul.f32 %v2324_v34, %v3189_v41 }
 0x2ef   :  { %v589_v8 = vsub.f32 %v540_v31, %v582_v38  ;;  %v922_v26 = vpop.permute.xlu0 %921  ;;  %v1007_v38 = vmul.f32 %v2323_v17, %v3005_v15  ;;  %v1123_v15 = vmul.f32 %v2325_v52, %v3019_v56 }
 0x2f0   :  { %v929_v32 = vsel %vm580_vm2, %v922_v26, %v924_v9  ;;  %v663_v60 = vadd.f32 %v659_v7, %v590_v55  ;;  %v2327_v26 = vld [vmem:[%s3540_s3 + $0x68] sm:$0xff] }
 0x2f1   :  { %v935_v47 = vsub.f32 %v892_v59, %v929_v32  ;;  %v662_v14 = vadd.f32 %v658_v19, %v589_v8  ;;  %v696_v22 = vpop.permute.xlu1 %695  ;;  %v1237_v19 = vmul.f32 %v2327_v26, %v2921_v29  ;;  %v2328_v29 = vld [vmem:[%s3540_s3 + $0x60] sm:$0xff] }
 0x2f2   :  { %v698_v40 = vsel %vm580_vm2, %v3394_v51, %v696_v22  ;;  %v706_v4 = vsub.f32 %v663_v60, %v696_v22 }
 0x2f3   :  { %v705_v44 = vsub.f32 %v662_v14, %v698_v40  ;;  %v1040_v11 = vpop.permute.xlu0 %1039  ;;  %v1008_v27 = vadd.f32 %v1004_v35, %v935_v47  ;;  %v1122_v14 = vmul.f32 %v2326_v0, %v3308_v50 }
 0x2f4   :  { %v1052_v30 = vsub.f32 %v1009_v49, %v1040_v11  ;;  %v779_v18 = vadd.f32 %v775_v53, %v706_v4 }
 0x2f5   :  { %v778_v41 = vadd.f32 %v774_v24, %v705_v44  ;;  %v812_v46 = vpop.permute.xlu1 %811  ;;  %v1239_v44 = vmul.f32 %v2327_v26, %v3029_v61  ;;  %v1238_v24 = vmul.f32 %v2328_v29, %v3323_v20 }
 0x2f6   :  { %v814_v51 = vsel %vm580_vm2, %v810_v36, %v812_v46  ;;  %v822_v9 = vsub.f32 %v779_v18, %v812_v46  ;;  %v1125_v39 = vadd.f32 %v1121_v3, %v1052_v30  ;;  %v1120_v36 = vmul.f32 %v2326_v0, %v3198_v21 }
 0x2f7   :  { %v821_v59 = vsub.f32 %v778_v41, %v814_v51  ;;  %v1038_v2 = vpop.permute.xlu0 %1037 }
 0x2f8   :  { %v1045_v62 = vsel %vm580_vm2, %v1038_v2, %v1040_v11  ;;  %v895_v6 = vadd.f32 %v891_v13, %v822_v9 }
 0x2f9   :  { %v1051_v43 = vsub.f32 %v1008_v27, %v1045_v62  ;;  %v894_v31 = vadd.f32 %v890_v57, %v821_v59  ;;  %v928_v37 = vpop.permute.xlu1 %927  ;;  %v2330_v62 = vld [vmem:[%s3540_s3 + $0x78] sm:$0xff] }
 0x2fa   :  { %v930_v12 = vsel %vm580_vm2, %v3412_v48, %v928_v37  ;;  %v938_v42 = vsub.f32 %v895_v6, %v928_v37  ;;  %v1353_v6 = vmul.f32 %v2330_v62, %v3575_v45  ;;  %v3582_v45 = vld [vmem:[#allocation4_spill] sm:$0xff] }
 0x2fb   :  { %v937_v55 = vsub.f32 %v894_v31, %v930_v12  ;;  %v1156_v1 = vpop.permute.xlu0 %1155  ;;  %v1124_v7 = vadd.f32 %v1120_v36, %v1051_v43 }
 0x2fc   :  { %v1168_v49 = vsub.f32 %v1125_v39, %v1156_v1  ;;  %v1011_v8 = vadd.f32 %v1007_v38, %v938_v42 }
 0x2fd   :  { %v1010_v21 = vadd.f32 %v1006_v16, %v937_v55  ;;  %v1044_v32 = vpop.permute.xlu1 %1043  ;;  %v1355_v55 = vmul.f32 %v2330_v62, %v3044_v5  ;;  %v3581_v16 = vld [vmem:[#allocation5_spill] sm:$0xff] }
 0x2fe   :  { %v1046_v48 = vsel %vm580_vm2, %v3422_v33, %v1044_v32  ;;  %v1054_v60 = vsub.f32 %v1011_v8, %v1044_v32  ;;  %v1241_v17 = vadd.f32 %v1237_v19, %v1168_v49  ;;  %v1236_v33 = vmul.f32 %v2328_v29, %v3207_v10  ;;  %v2329_v10 = vld [vmem:[%s3540_s3 + $0x70] sm:$0xff]  ;;  %v3583_v8 = vld [vmem:[#allocation9_spill] sm:$0xff] }
 0x2ff   :  { %v1053_v47 = vsub.f32 %v1010_v21, %v1046_v48  ;;  %v1154_v25 = vpop.permute.xlu0 %1153  ;;  %v1841_v49 = vrot.slane %v3582_v45, 4  ;;  %v1354_v26 = vmul.f32 %v2329_v10, %v3583_v8 }
 0x300   :  { %v1161_v22 = vsel %vm580_vm2, %v1154_v25, %v1156_v1  ;;  %v1127_v34 = vadd.f32 %v1123_v15, %v1054_v60  ;;  %v1840_v15 = vrot.slane %v3581_v16, 4 }
 0x301   :  { %v1167_v35 = vsub.f32 %v1124_v7, %v1161_v22  ;;  %v1126_v40 = vadd.f32 %v1122_v14, %v1053_v47  ;;  %v1160_v4 = vpop.permute.xlu1 %1159  ;;  %v1792_v7 = vsel %vm1790_vm0, %v3581_v16, 0  ;;  %v1785_v14 = vld [vmem:[%s3544_s7] sm:$0xf] }
 0x302   :  { %v1162_v56 = vsel %vm580_vm2, %v3425_v28, %v1160_v4  ;;  %v1170_v53 = vsub.f32 %v1127_v34, %v1160_v4  ;;  %v3580_v28 = vld [vmem:[#allocation8_spill] sm:$0xff]  ;;  %v1843_v29 = vsel %vm1790_vm0, %v1840_v15, 0 }
 0x303   :  { %v1169_v11 = vsub.f32 %v1126_v40, %v1162_v56  ;;  %v1240_v50 = vadd.f32 %v1236_v33, %v1167_v35  ;;  %v1272_v18 = vpop.permute.xlu0 %1271  ;;  %v1352_v51 = vmul.f32 %v2329_v10, %v3580_v28 }
 0x304   :  { %v1243_v27 = vadd.f32 %v1239_v44, %v1170_v53  ;;  %v1284_v20 = vsub.f32 %v1241_v17, %v1272_v18 }
 0x305   :  { %v1242_v30 = vadd.f32 %v1238_v24, %v1169_v11  ;;  %v1276_v61 = vpop.permute.xlu1 %1275 }
 0x306   :  { %v1286_v31 = vsub.f32 %v1243_v27, %v1276_v61  ;;  %v1357_v42 = vadd.f32 %v1353_v6, %v1284_v20 }
 0x308   :  { %v1359_v21 = vadd.f32 %v1355_v55, %v1286_v31 }
 0x325   :  { %v2170_v52 = vpop.permute.xlu0 %2169 }
 0x326   :  { %v2172_v13 = vunpack.i.h.bf16 %v2170_v52  ;;  %v2171_v39 = vunpack.i.l.bf16 %v2170_v52 }
 0x328   :  { %v1458_v37 = vsel %vm560_vm1, %v2171_v39, %v2172_v13 }
 0x329   :  { %v1270_v3 = vpop.permute.xlu0 %1269 }
 0x32a   :  { %v1277_v41 = vsel %vm580_vm2, %v1270_v3, %v1272_v18 }
 0x32b   :  { %v1283_v46 = vsub.f32 %v1240_v50, %v1277_v41 }
 0x32d   :  { %v1356_v9 = vadd.f32 %v1352_v51, %v1283_v46 }
 0x345   :  { %v2175_v59 = vpop.permute.xlu1 %2174 }
 0x346   :  { %v2177_v2 = vunpack.i.h.bf16 %v2175_v59  ;;  %v2176_v57 = vunpack.i.l.bf16 %v2175_v59 }
 0x347   :  { %v1388_v43 = vpop.permute.xlu0 %1387 }
 0x348   :  { %v1459_v0 = vsel %vm560_vm1, %v2176_v57, %v2177_v2  ;;  %v1400_v19 = vsub.f32 %v1357_v42, %v1388_v43 }
 0x349   :  { %v1468_v36 = vpack.c.bf16 %v1459_v0, %v1458_v37  ;;  %v1274_v12 = vpop.permute.xlu1 %1273 }
 0x34a   :  { %v1278_v38 = vsel %vm580_vm2, %v1274_v12, %v1276_v61  ;;  %v1464_v47 = vsel %vm560_vm1, %v1400_v19, %v2171_v39 }
 0x34b   :  { %v1285_v1 = vsub.f32 %v1242_v30, %v1278_v38  ;;  %2133 = vmatmul.mubr.msk.bf16.vlgmr.msra.gmra.mrb[4].mxu0 %vm1685_vm3, %v1468_v36  ;;  %v1386_v32 = vpop.permute.xlu0 %1385 }
 0x34c   :  { %1798 = vmatpush1.bf16.msra.mxu0 %v1792_v7  ;;  %1829 = vmatprep.mubr.bf16.mxu0 %v2334_v23  ;;  %v1393_v17 = vsel %vm580_vm2, %v1386_v32, %v1388_v43 }
 0x34d   :  { %2136 = vmatprep.subr.msk.bf16.mxu0 %vm1790_vm0, %v1841_v49  ;;  %v1392_v48 = vpop.permute.xlu1 %1391  ;;  %v1358_v60 = vadd.f32 %v1354_v26, %v1285_v1  ;;  %v1399_v40 = vsub.f32 %v1356_v9, %v1393_v17 }
 0x34e   :  { %v1402_v5 = vsub.f32 %v1359_v21, %v1392_v48 }
 0x350   :  { %v1465_v25 = vsel %vm560_vm1, %v1402_v5, %v2176_v57 }
 0x351   :  { %v1390_v22 = vpop.permute.xlu1 %1389  ;;  %v1467_v34 = vpack.c.bf16 %v1465_v25, %v1464_v47 }
 0x352   :  { %v1394_v35 = vsel %vm580_vm2, %v1390_v22, %v1392_v48 }
 0x353   :  { %v1401_v4 = vsub.f32 %v1358_v60, %v1394_v35  ;;  %1721 = vmatprep.mubr.bf16.mxu1 %v1467_v34  ;;  %2135 = vmatmul.mubr.msk.bf16.vlgmr.msra.gmra.mrb[8].mxu0 %vm1786_vm4, %v1785_v14 }
 0x354   :  { %1849 = vmatpush1.bf16.msra.mxu0 %v1843_v29  ;;  %1880 = vmatprep.mubr.bf16.mxu0 %v2334_v23 }
 0x355   :  { %v1466_v33 = vpack.c.bf16 %v1401_v4, %v1399_v40 }
 0x357   :  { %1722 = vmatmul.mubr.bf16.vlgmr.msra.gmra.mrb[4].mxu1 %v1466_v33 }
 0x35b   :  { %2137 = vmatmul.mubr.msk.bf16.vlgmr.msra.gmra.mrb[12].mxu0 %vm1786_vm4, %v1785_v14 }
 0x35c   :  { %v1779_v3 = vpop.permute.xlu0 %1778 }
 0x362   :  { %v1891_v30 = vpop.permute.xlu1 %1890 }
 0x41e   :  { %v1766_v56 = vpop.f32.mrb[4].mxu0 }
 0x41f   :  { %v1768_v53 = vpop.f32.mrb[5].mxu0 }
 0x420   :  { %v1770_v44 = vpop.f32.mrb[6].mxu0 }
 0x421   :  { %v1772_v11 = vpop.f32.mrb[7].mxu0 }
 0x426   :  { %v1831_v50 = vpop.f32.mrb[8].mxu0 }
 0x427   :  { %v1833_v24 = vpop.f32.mrb[9].mxu0  ;;  %v1893_v51 = vadd.f32 %v1891_v30, %v1831_v50 }
 0x428   :  { %v1835_v27 = vpop.f32.mrb[10].mxu0  ;;  %v1894_v13 = vadd.f32 %v1891_v30, %v1833_v24 }
 0x429   :  { %v1836_v18 = vpop.f32.mrb[11].mxu0 }
 0x42a   :  { %v1723_v52 = vpop.f32.mrb[4].mxu1 }
 0x42b   :  { %v1767_v41 = vadd.f32 %v1766_v56, %v1723_v52  ;;  %v1725_v46 = vpop.f32.mrb[5].mxu1 }
 0x42c   :  { %v1769_v10 = vadd.f32 %v1768_v53, %v1725_v46  ;;  %v1727_v28 = vpop.f32.mrb[6].mxu1 }
 0x42d   :  { %v1781_v23 = vadd.f32 %v1779_v3, %v1767_v41  ;;  %v1771_v9 = vadd.f32 %v1770_v44, %v1727_v28  ;;  %v1729_v61 = vpop.f32.mrb[7].mxu1 }
 0x42e   :  { %v1782_v39 = vadd.f32 %v1779_v3, %v1769_v10  ;;  %v1773_v59 = vadd.f32 %v1772_v11, %v1729_v61  ;;  %v1882_v20 = vpop.f32.mrb[12].mxu0 }
 0x42f   :  { %v1897_v2 = vadd.f32 %v1893_v51, %v1781_v23  ;;  %v1783_v57 = vadd.f32 %v1779_v3, %v1771_v9  ;;  %v1895_v62 = vadd.f32 %v1891_v30, %v1882_v20  ;;  %v1884_v6 = vpop.f32.mrb[13].mxu0 }
 0x430   :  { %v1898_v43 = vadd.f32 %v1894_v13, %v1782_v39  ;;  %v1784_v31 = vadd.f32 %v1779_v3, %v1773_v59  ;;  %v1896_v37 = vadd.f32 %v1891_v30, %v1884_v6  ;;  %v1886_v0 = vpop.f32.mrb[14].mxu0 }
 0x431   :  { %v1899_v36 = vadd.f32 %v1895_v62, %v1783_v57  ;;  %v1887_v12 = vpop.f32.mrb[15].mxu0  ;;  %v1905_v42 = vmul.f32 0.044715, %v1897_v2  ;;  %v1901_v35 = vmul.f32 0.5, %v1897_v2 }
 0x432   :  { %v1900_v38 = vadd.f32 %v1896_v37, %v1784_v31  ;;  %v1906_v55 = vmul.f32 0.044715, %v1898_v43  ;;  %v1902_v29 = vmul.f32 0.5, %v1898_v43 }
 0x433   :  { %v1907_v1 = vmul.f32 0.044715, %v1899_v36  ;;  %v1909_v16 = vmul.f32 %v1905_v42, %v1897_v2  ;;  %v1903_v44 = vmul.f32 0.5, %v1899_v36 }
 0x434   :  { %v1908_v7 = vmul.f32 0.044715, %v1900_v38  ;;  %v1910_v45 = vmul.f32 %v1906_v55, %v1898_v43  ;;  %v1904_v24 = vmul.f32 0.5, %v1900_v38  ;;  %v3584_v55 = vld [vmem:[#allocation7_spill] sm:$0xff] }
 0x435   :  { %v1911_v49 = vmul.f32 %v1907_v1, %v1899_v36  ;;  %v1913_v8 = vmul.f32 %v1909_v16, %v1897_v2 }
 0x436   :  { %v1912_v26 = vmul.f32 %v1908_v7, %v1900_v38  ;;  %v1914_v19 = vmul.f32 %v1910_v45, %v1898_v43 }
 0x437   :  { %v1917_v21 = vadd.f32 %v1913_v8, %v1897_v2  ;;  %v1915_v32 = vmul.f32 %v1911_v49, %v1899_v36 }
 0x438   :  { %v1918_v48 = vadd.f32 %v1914_v19, %v1898_v43  ;;  %v1916_v60 = vmul.f32 %v1912_v26, %v1900_v38 }
 0x439   :  { %v1921_v5 = vmul.f32 0.7978846, %v1917_v21  ;;  %v1919_v15 = vadd.f32 %v1915_v32, %v1899_v36  ;;  %v2331_v36 = vld [vmem:[%s3542_s1] sm:$0xff] }
 0x43a   :  { %v1922_v17 = vmul.f32 0.7978846, %v1918_v48  ;;  %v1920_v47 = vadd.f32 %v1916_v60, %v1900_v38  ;;  %v1972_v12 = vrot.slane %v2331_v36, %v2799_v54  ;;  %v1976_v42 = vrot.slane %v2331_v36, %v2898_v58 }
 0x43b   :  { %2303 = vtanh.f32 %v1921_v5  ;;  %v1923_v25 = vmul.f32 0.7978846, %v1919_v15  ;;  %v1994_v38 = vrot.slane %v2331_v36, %v2826_v63  ;;  %v1998_v1 = vrot.slane %v2331_v36, %v3584_v55 }
 0x43c   :  { %2305 = vtanh.f32 %v1922_v17  ;;  %v1924_v14 = vmul.f32 0.7978846, %v1920_v47  ;;  %v1982_v16 = vrot.slane %v1972_v12, %v2799_v54  ;;  %v1986_v7 = vrot.slane %v1976_v42, %v2799_v54 }
 0x43d   :  { %2307 = vtanh.f32 %v1923_v25  ;;  %v2004_v49 = vrot.slane %v1994_v38, %v2826_v63  ;;  %v2008_v8 = vrot.slane %v1998_v1, %v2826_v63 }
 0x43e   :  { %2309 = vtanh.f32 %v1924_v14 }
 0x445   :  { %v2304_v22 = vpop.eup %2303 }
 0x446   :  { %v2306_v34 = vpop.eup %2305  ;;  %v1929_v40 = vadd.f32 1.0, %v2304_v22 }
 0x447   :  { %v2308_v4 = vpop.eup %2307  ;;  %v1930_v33 = vadd.f32 1.0, %v2306_v34 }
 0x448   :  { %v2310_v56 = vpop.eup %2309  ;;  %v1933_v53 = vmul.f32 %v1929_v40, %v1901_v35  ;;  %v1931_v11 = vadd.f32 1.0, %v2308_v4 }
 0x449   :  { %v1934_v50 = vmul.f32 %v1930_v33, %v1902_v29  ;;  %v1932_v27 = vadd.f32 1.0, %v2310_v56 }
 0x44a   :  { %v1935_v30 = vmul.f32 %v1931_v11, %v1903_v44 }
 0x44b   :  { %v1937_v18 = vadd.f32 %v1934_v50, %v1933_v53  ;;  %v1936_v52 = vmul.f32 %v1932_v27, %v1904_v24 }
 0x44d   :  { %1938 = vadd.xlane.f32.xlu1 %v1937_v18  ;;  %v1940_v3 = vadd.f32 %v1936_v52, %v1935_v30 }
 0x44f   :  { %1941 = vadd.xlane.f32.xlu0 %v1940_v3 }
 0x4da   :  { %v1939_v41 = vpop.xlane.xlu1 %1938 }
 0x4db   :  { %v1943_v46 = vmul.f32 0.00390625, %v1939_v41 }
 0x4dc   :  { %v1942_v10 = vpop.xlane.xlu0 %1941 }
 0x4dd   :  { %v1945_v28 = vsub.f32 %v1933_v53, %v1943_v46  ;;  %v1946_v51 = vsub.f32 %v1934_v50, %v1943_v46  ;;  %v1944_v23 = vmul.f32 0.00390625, %v1942_v10 }
 0x4df   :  { %v1949_v9 = vmul.f32 %v1945_v28, %v1945_v28  ;;  %v1950_v61 = vmul.f32 %v1946_v51, %v1946_v51  ;;  %v1947_v13 = vsub.f32 %v1935_v30, %v1944_v23  ;;  %v1948_v39 = vsub.f32 %v1936_v52, %v1944_v23 }
 0x4e1   :  { %v1951_v59 = vmul.f32 %v1947_v13, %v1947_v13  ;;  %v1952_v20 = vmul.f32 %v1948_v39, %v1948_v39  ;;  %v1953_v2 = vadd.f32 %v1950_v61, %v1949_v9 }
 0x4e3   :  { %1954 = vadd.xlane.f32.xlu0 %v1953_v2  ;;  %v1956_v57 = vadd.f32 %v1952_v20, %v1951_v59 }
 0x4e7   :  { %1957 = vadd.xlane.f32.xlu0 %v1956_v57 }
 0x570   :  { %v1955_v62 = vpop.xlane.xlu0 %1954 }
 0x571   :  { %v1959_v6 = vmul.f32 0.00390625, %v1955_v62 }
 0x573   :  { %v1961_v43 = vadd.f32 1e-06, %v1959_v6 }
 0x574   :  { %v1958_v31 = vpop.xlane.xlu0 %1957 }
 0x575   :  { %2311 = vrsqrt.f32 %v1961_v43  ;;  %v1960_v37 = vmul.f32 0.00390625, %v1958_v31 }
 0x577   :  { %v1962_v0 = vadd.f32 1e-06, %v1960_v37 }
 0x579   :  { %2313 = vrsqrt.f32 %v1962_v0 }
 0x57f   :  { %v2312_v45 = vpop.eup %2311 }
 0x580   :  { %v1965_v26 = vmul.f32 %v2312_v45, %v1945_v28  ;;  %v1966_v19 = vmul.f32 %v2312_v45, %v1946_v51 }
 0x582   :  { %v1987_v21 = vmul.f32 %v1982_v16, %v1965_v26  ;;  %v1988_v32 = vmul.f32 %v1986_v7, %v1966_v19 }
 0x583   :  { %v2314_v48 = vpop.eup %2313 }
 0x584   :  { %v2009_v60 = vadd.f32 %v2004_v49, %v1987_v21  ;;  %v2010_v58 = vadd.f32 %v2008_v8, %v1988_v32  ;;  %v1967_v5 = vmul.f32 %v2314_v48, %v1947_v13  ;;  %v1968_v15 = vmul.f32 %v2314_v48, %v1948_v39 }
 0x586   :  { %2013 = vst [vmem:[%s3545_s8] sm:$0xff] %v2009_v60  ;;  %2014 = vst [vmem:[%s3545_s8 + $0x8] sm:$0xff] %v2010_v58  ;;  %v1989_v54 = vmul.f32 %v1982_v16, %v1967_v5  ;;  %v1990_v17 = vmul.f32 %v1986_v7, %v1968_v15 }
 0x588   :  { %v2011_v63 = vadd.f32 %v2004_v49, %v1989_v54  ;;  %v2012_v47 = vadd.f32 %v2008_v8, %v1990_v17 }
 0x58a   :  { %2015 = vst [vmem:[%s3545_s8 + $0x10] sm:$0xff] %v2011_v63  ;;  %2016 = vst [vmem:[%s3545_s8 + $0x18] sm:$0xff] %v2012_v47 }

</bundles_post_ra>
